<compile_context>
chip_gen: v7x
topology: tpu7x:2x2x1
jax: 0.10.0
libtpu: 0.0.40
codegen_flags: <defaults>
</compile_context>

<pallas_src>
import functools

import jax
import jax.numpy as jnp
from jax import lax
from jax.experimental import pallas as pl
from jax.experimental.pallas import tpu as pltpu


# ----------------------------------------------------------------------------
# Padding helpers (zero padding => numerically inert, see analysis above).
# ----------------------------------------------------------------------------
def _round_up(x, m):
    return (x + m - 1) // m * m


def _pad_gate_weight(w, in_pad, h_pad):
    """(in, 4H) -> (in_pad, 4*h_pad); each of the 4 gate blocks padded to h_pad."""
    in_dim, four_h = w.shape
    h = four_h // 4
    w4 = w.reshape(in_dim, 4, h)
    w4 = jnp.pad(w4, ((0, in_pad - in_dim), (0, 0), (0, h_pad - h)))
    return w4.reshape(in_pad, 4 * h_pad)


def _pad_gate_bias(b, h_pad):
    """(1, 4H) -> (1, 4*h_pad); each gate block padded to h_pad."""
    four_h = b.shape[-1]
    h = four_h // 4
    b4 = b.reshape(4, h)
    b4 = jnp.pad(b4, ((0, 0), (0, h_pad - h)))
    return b4.reshape(1, 4 * h_pad)


def _pad_2d(x, rows, cols):
    r, c = x.shape
    return jnp.pad(x, ((0, rows - r), (0, cols - c)))


# ----------------------------------------------------------------------------
# Kernel 1: LSTM recurrence, single grid step, in-kernel time loop.
# ----------------------------------------------------------------------------
def _lstm_kernel(x_ref, wih_ref, whh_ref, b_ref, h_out_ref, *, seq_len, hidden_pad):
    """x_ref: (T, B_pad, E_pad) bf16. Emits h per step -> h_out_ref (T, B_pad, H_pad) f32.

    PyTorch gate order (i, f, g, o); zero initial (h, c).
    """
    H = hidden_pad
    B = x_ref.shape[1]

    w_ih = wih_ref[...]                                     # (E_pad, 4H_pad) bf16
    w_hh = whh_ref[...]                                     # (H_pad, 4H_pad) bf16
    # Hoist the bias broadcast out of the time loop (broadcast is not CSE'd).
    bias = jnp.broadcast_to(b_ref[...], (B, 4 * H)).astype(jnp.float32)

    def step(t, carry):
        h, c = carry                                        # f32 (B, H)
        x_t = x_ref[t]                                      # bf16 (B, E_pad)
        gates = (
            jnp.dot(x_t, w_ih, preferred_element_type=jnp.float32)
            + jnp.dot(h.astype(jnp.bfloat16), w_hh,
                      preferred_element_type=jnp.float32)
            + bias
        )                                                   # f32 (B, 4H)
        i_g = jax.nn.sigmoid(gates[:, 0 * H:1 * H])
        f_g = jax.nn.sigmoid(gates[:, 1 * H:2 * H])
        g_g = jnp.tanh(gates[:, 2 * H:3 * H])
        o_g = jax.nn.sigmoid(gates[:, 3 * H:4 * H])
        c_new = f_g * c + i_g * g_g
        h_new = o_g * jnp.tanh(c_new)
        h_out_ref[t] = h_new                                # (B, H) f32 store
        return (h_new, c_new)

    zeros = jnp.zeros((B, H), jnp.float32)
    lax.fori_loop(0, seq_len, step, (zeros, zeros), unroll=(seq_len <= 32))


def lstm_pallas(x_p, w_ih_p, w_hh_p, b_p):
    """x_p: (T, B_pad, E_pad) bf16 -> h: (T, B_pad, H_pad) f32."""
    T, B_pad, E_pad = x_p.shape
    H_pad = w_ih_p.shape[1] // 4

    kernel = functools.partial(_lstm_kernel, seq_len=T, hidden_pad=H_pad)

    return pl.pallas_call(
        kernel,
        out_shape=jax.ShapeDtypeStruct((T, B_pad, H_pad), jnp.float32),
        grid_spec=pltpu.PrefetchScalarGridSpec(
            num_scalar_prefetch=0,
            grid=(1,),
            in_specs=[
                pl.BlockSpec((T, B_pad, E_pad), lambda i: (0, 0, 0)),     # x
                pl.BlockSpec((E_pad, 4 * H_pad), lambda i: (0, 0)),       # W_ih
                pl.BlockSpec((H_pad, 4 * H_pad), lambda i: (0, 0)),       # W_hh
                pl.BlockSpec((1, 4 * H_pad), lambda i: (0, 0)),           # bias
            ],
            out_specs=pl.BlockSpec((T, B_pad, H_pad), lambda i: (0, 0, 0)),
        ),
        compiler_params=pltpu.CompilerParams(
            dimension_semantics=("arbitrary",),   # single (sequential) step
        ),
    )(x_p, w_ih_p, w_hh_p, b_p)


# ----------------------------------------------------------------------------
# Kernel 2: the hoisted vocab projection as a tiled parallel matmul.
# ----------------------------------------------------------------------------
def _fc_kernel(h_ref, w_ref, b_ref, out_ref):
    out_ref[...] = (
        jnp.dot(h_ref[...], w_ref[...], preferred_element_type=jnp.float32)
        + b_ref[...]
    )


def fc_pallas(h_flat, fc_w, fc_b, *, tm=128, tn=256):
    """(M, K) bf16 @ (K, N) bf16 + (1, N) f32 -> (M, N) f32, tiled over M and N."""
    M, K = h_flat.shape
    N = fc_w.shape[1]                       # already a multiple of 128
    tn = tn if N % tn == 0 else 128
    M_p = _round_up(M, tm)
    if M_p != M:
        h_flat = jnp.pad(h_flat, ((0, M_p - M), (0, 0)))

    out = pl.pallas_call(
        _fc_kernel,
        out_shape=jax.ShapeDtypeStruct((M_p, N), jnp.float32),
        grid_spec=pltpu.PrefetchScalarGridSpec(
            num_scalar_prefetch=0,
            grid=(M_p // tm, N // tn),
            in_specs=[
                pl.BlockSpec((tm, K), lambda i, j: (i, 0)),   # h tile
                pl.BlockSpec((K, tn), lambda i, j: (0, j)),   # fc weight tile
                pl.BlockSpec((1, tn), lambda i, j: (0, j)),   # fc bias tile
            ],
            out_specs=pl.BlockSpec((tm, tn), lambda i, j: (i, j)),
        ),
        compiler_params=pltpu.CompilerParams(
            dimension_semantics=("parallel", "parallel"),     # megacore-shardable
        ),
    )(h_flat, fc_w, fc_b)
    return out[:M]


# ----------------------------------------------------------------------------
# Module wrapper (parameters as JAX arrays; forward mirrors the PyTorch module).
# ----------------------------------------------------------------------------
class DecoderRNNPallas:

    def __init__(self, embed_size, hidden_size, vocab_size, key):
        self.embed_size = embed_size
        self.hidden_size = hidden_size
        self.vocab_size = vocab_size
        ks = jax.random.split(key, 7)
        s = 0.1
        self.embedding = jax.random.normal(ks[0], (vocab_size, embed_size), jnp.float32) * s
        # LSTM params stored transposed relative to PyTorch: (in, 4H), gate order i,f,g,o.
        self.w_ih = jax.random.normal(ks[1], (embed_size, 4 * hidden_size), jnp.float32) * s
        self.w_hh = jax.random.normal(ks[2], (hidden_size, 4 * hidden_size), jnp.float32) * s
        b_ih = jax.random.normal(ks[3], (4 * hidden_size,), jnp.float32) * s
        b_hh = jax.random.normal(ks[4], (4 * hidden_size,), jnp.float32) * s
        self.b = (b_ih + b_hh).reshape(1, 4 * hidden_size)
        self.fc_w = jax.random.normal(ks[5], (hidden_size, vocab_size), jnp.float32) * s
        self.fc_b = (jax.random.normal(ks[6], (vocab_size,), jnp.float32) * s).reshape(1, vocab_size)

        # Padded / bf16-cast kernel parameters (zero padding in all padded lanes).
        self.E_pad = _round_up(embed_size, 128)
        self.H_pad = _round_up(hidden_size, 128)
        self.V_pad = _round_up(vocab_size, 128)
        self.w_ih_p = _pad_gate_weight(self.w_ih, self.E_pad, self.H_pad).astype(jnp.bfloat16)
        self.w_hh_p = _pad_gate_weight(self.w_hh, self.H_pad, self.H_pad).astype(jnp.bfloat16)
        self.b_p = _pad_gate_bias(self.b, self.H_pad)                        # f32
        self.fc_w_p = _pad_2d(self.fc_w, self.H_pad, self.V_pad).astype(jnp.bfloat16)
        self.fc_b_p = _pad_2d(self.fc_b, 1, self.V_pad)                      # f32

    def forward(self, features, captions):
        # features: (B, E) float32, captions: (B, Tc) int32
        captions = captions[:, :-1]                                          # (B, Tc-1)
        emb = jnp.take(self.embedding, captions, axis=0)                     # (B, Tc-1, E)
        inputs = jnp.concatenate([features[:, None, :], emb], axis=1)        # (B, T, E)
        x_tbe = jnp.transpose(inputs, (1, 0, 2))                             # (T, B, E)
        T, B, E = x_tbe.shape
        B_pad = _round_up(B, 8)

        x_p = jnp.pad(
            x_tbe, ((0, 0), (0, B_pad - B), (0, self.E_pad - E))
        ).astype(jnp.bfloat16)                                               # (T, B_pad, E_pad)

        h_all = lstm_pallas(x_p, self.w_ih_p, self.w_hh_p, self.b_p)         # (T, B_pad, H_pad) f32
        h_flat = h_all.reshape(T * B_pad, self.H_pad).astype(jnp.bfloat16)
        logits_flat = fc_pallas(h_flat, self.fc_w_p, self.fc_b_p)            # (T*B_pad, V_pad) f32

        logits = logits_flat.reshape(T, B_pad, self.V_pad)[:, :B, :self.vocab_size]
        return jnp.transpose(logits, (1, 0, 2))                              # (B, T, V)


# ----------------------------------------------------------------------------
# Pure-JAX references for correctness checking.
# ----------------------------------------------------------------------------
def _reference_forward(model, features, captions, *, use_bf16):
    """lax.scan LSTM reference; use_bf16=True matches the kernel's matmul precision."""
    captions = captions[:, :-1]
    emb = jnp.take(model.embedding, captions, axis=0)
    inputs = jnp.concatenate([features[:, None, :], emb], axis=1)            # (B, T, E)
    x_tbe = jnp.transpose(inputs, (1, 0, 2))
    B = features.shape[0]
    H = model.hidden_size
    mdt = jnp.bfloat16 if use_bf16 else jnp.float32
    w_ih = model.w_ih.astype(mdt)
    w_hh = model.w_hh.astype(mdt)
    fc_w = model.fc_w.astype(mdt)
    x_tbe = x_tbe.astype(mdt)

    def step(carry, x_t):
        h, c = carry
        gates = (jnp.dot(x_t, w_ih, preferred_element_type=jnp.float32)
                 + jnp.dot(h.astype(mdt), w_hh, preferred_element_type=jnp.float32)
                 + model.b)
        i = jax.nn.sigmoid(gates[:, 0 * H:1 * H])
        f = jax.nn.sigmoid(gates[:, 1 * H:2 * H])
        g = jnp.tanh(gates[:, 2 * H:3 * H])
        o = jax.nn.sigmoid(gates[:, 3 * H:4 * H])
        c_new = f * c + i * g
        h_new = o * jnp.tanh(c_new)
        return (h_new, c_new), h_new

    init = (jnp.zeros((B, H), jnp.float32), jnp.zeros((B, H), jnp.float32))
    _, hs = lax.scan(step, init, x_tbe)                                      # (T, B, H) f32
    T = x_tbe.shape[0]
    logits = (jnp.dot(hs.astype(mdt).reshape(T * B, H), fc_w,
                      preferred_element_type=jnp.float32)
              + model.fc_b)
    return jnp.transpose(logits.reshape(T, B, model.vocab_size), (1, 0, 2))


if __name__ == "__main__":
    key = jax.random.PRNGKey(0)
    k_param, k_feat, k_cap = jax.random.split(key, 3)

    batch = 2
    embed_size = 32
    hidden_size = 32
    vocab_size = 64
    cap_len = 8          # captions length Tc; LSTM sequence length T == Tc

    model = DecoderRNNPallas(embed_size, hidden_size, vocab_size, k_param)

    features = jax.random.normal(k_feat, (batch, embed_size), jnp.float32)
    captions = jax.random.randint(k_cap, (batch, cap_len), 0, vocab_size, jnp.int32)

    out = jax.block_until_ready(model.forward(features, captions))
    assert out.shape == (batch, cap_len, vocab_size)

    # Check against a reference doing the same mixed-precision math (tight),
    # and against the full-f32 reference (loose, bf16 rounding only).
    ref_mixed = jax.block_until_ready(
        _reference_forward(model, features, captions, use_bf16=True))
    ref_f32 = jax.block_until_ready(
        _reference_forward(model, features, captions, use_bf16=False))
    assert jnp.allclose(out, ref_mixed, atol=1e-2, rtol=1e-2)
    assert jnp.allclose(out, ref_f32, atol=5e-2, rtol=5e-2)

    print("KERNEL_OK")
</pallas_src>

<mosaic_0001>
module attributes {stable_mosaic.version = 11 : i64} {
  func.func @_lstm_kernel(%arg0: i32, %arg1: memref<8x8x128xbf16, #tpu.memory_space<vmem>>, %arg2: memref<128x512xbf16, #tpu.memory_space<vmem>>, %arg3: memref<128x512xbf16, #tpu.memory_space<vmem>>, %arg4: memref<1x512xf32, #tpu.memory_space<vmem>>, %arg5: memref<8x8x128xf32, #tpu.memory_space<vmem>>) attributes {dimension_semantics = [#tpu.dimension_semantics<arbitrary>], iteration_bounds = array<i64: 1>, scalar_prefetch = 0 : i64, scratch_operands = 0 : i64, tpu.core_type = #tpu.core_type<tc>, window_params = [{pipeline_mode = #tpu.pipeline_mode<synchronous>, transform_indices = @transform_0, window_bounds = array<i64: 8, 8, 128>}, {pipeline_mode = #tpu.pipeline_mode<synchronous>, transform_indices = @transform_1, window_bounds = array<i64: 128, 512>}, {pipeline_mode = #tpu.pipeline_mode<synchronous>, transform_indices = @transform_2, window_bounds = array<i64: 128, 512>}, {pipeline_mode = #tpu.pipeline_mode<synchronous>, transform_indices = @transform_3, window_bounds = array<i64: 1, 512>}, {pipeline_mode = #tpu.pipeline_mode<synchronous>, transform_indices = @transform_4, window_bounds = array<i64: 8, 8, 128>}]} {
    %c0 = arith.constant 0 : index
    %c0_0 = arith.constant 0 : index
    %0 = vector.load %arg2[%c0, %c0_0] : memref<128x512xbf16, #tpu.memory_space<vmem>>, vector<128x512xbf16>
    %c0_1 = arith.constant 0 : index
    %c0_2 = arith.constant 0 : index
    %1 = vector.load %arg3[%c0_1, %c0_2] : memref<128x512xbf16, #tpu.memory_space<vmem>>, vector<128x512xbf16>
    %c0_3 = arith.constant 0 : index
    %c0_4 = arith.constant 0 : index
    %2 = vector.load %arg4[%c0_3, %c0_4] : memref<1x512xf32, #tpu.memory_space<vmem>>, vector<1x512xf32>
    %3 = vector.shape_cast %2 : vector<1x512xf32> to vector<1x512xf32>
    %4 = vector.broadcast %3 : vector<1x512xf32> to vector<8x512xf32>
    %cst = arith.constant 0.000000e+00 : f32
    %5 = vector.broadcast %cst : f32 to vector<8x128xf32>
    %c0_i32 = arith.constant 0 : i32
    %6 = arith.index_cast %c0_i32 : i32 to index
    %c0_5 = arith.constant 0 : index
    %c0_6 = arith.constant 0 : index
    %7 = vector.load %arg1[%6, %c0_5, %c0_6] : memref<8x8x128xbf16, #tpu.memory_space<vmem>>, vector<1x8x128xbf16>
    %8 = vector.shape_cast %7 : vector<1x8x128xbf16> to vector<8x128xbf16>
    %cst_7 = arith.constant dense<0.000000e+00> : vector<8x512xf32>
    %9 = tpu.matmul %8, %0, %cst_7 {dimension_numbers = #tpu.dot_dimension_numbers<[1], [0], [0], [1], [0, 0, 1, 1], [], []>} : vector<8x128xbf16>, vector<128x512xbf16>, vector<8x512xf32> -> vector<8x512xf32>
    %10 = arith.truncf %5 : vector<8x128xf32> to vector<8x128xbf16>
    %cst_8 = arith.constant dense<0.000000e+00> : vector<8x512xf32>
    %11 = tpu.matmul %10, %1, %cst_8 {dimension_numbers = #tpu.dot_dimension_numbers<[1], [0], [0], [1], [0, 0, 1, 1], [], []>} : vector<8x128xbf16>, vector<128x512xbf16>, vector<8x512xf32> -> vector<8x512xf32>
    %12 = arith.addf %9, %11 : vector<8x512xf32>
    %13 = arith.addf %12, %4 : vector<8x512xf32>
    %14 = vector.extract_strided_slice %13 {offsets = [0, 0], sizes = [8, 128], strides = [1, 1]} : vector<8x512xf32> to vector<8x128xf32>
    %15 = arith.negf %14 : vector<8x128xf32>
    %16 = math.exp %15 : vector<8x128xf32>
    %cst_9 = arith.constant 1.000000e+00 : f32
    %17 = vector.broadcast %cst_9 : f32 to vector<8x128xf32>
    %18 = arith.addf %17, %16 : vector<8x128xf32>
    %19 = arith.divf %17, %18 : vector<8x128xf32>
    %20 = vector.extract_strided_slice %13 {offsets = [0, 128], sizes = [8, 128], strides = [1, 1]} : vector<8x512xf32> to vector<8x128xf32>
    %21 = arith.negf %20 : vector<8x128xf32>
    %22 = math.exp %21 : vector<8x128xf32>
    %cst_10 = arith.constant 1.000000e+00 : f32
    %23 = vector.broadcast %cst_10 : f32 to vector<8x128xf32>
    %24 = arith.addf %23, %22 : vector<8x128xf32>
    %25 = arith.divf %23, %24 : vector<8x128xf32>
    %26 = vector.extract_strided_slice %13 {offsets = [0, 256], sizes = [8, 128], strides = [1, 1]} : vector<8x512xf32> to vector<8x128xf32>
    %27 = math.tanh %26 : vector<8x128xf32>
    %28 = vector.extract_strided_slice %13 {offsets = [0, 384], sizes = [8, 128], strides = [1, 1]} : vector<8x512xf32> to vector<8x128xf32>
    %29 = arith.negf %28 : vector<8x128xf32>
    %30 = math.exp %29 : vector<8x128xf32>
    %cst_11 = arith.constant 1.000000e+00 : f32
    %31 = vector.broadcast %cst_11 : f32 to vector<8x128xf32>
    %32 = arith.addf %31, %30 : vector<8x128xf32>
    %33 = arith.divf %31, %32 : vector<8x128xf32>
    %34 = arith.mulf %25, %5 : vector<8x128xf32>
    %35 = arith.mulf %19, %27 : vector<8x128xf32>
    %36 = arith.addf %34, %35 : vector<8x128xf32>
    %37 = math.tanh %36 : vector<8x128xf32>
    %38 = arith.mulf %33, %37 : vector<8x128xf32>
    %39 = arith.index_cast %c0_i32 : i32 to index
    %c0_12 = arith.constant 0 : index
    %c0_13 = arith.constant 0 : index
    %40 = vector.load %arg5[%39, %c0_12, %c0_13] : memref<8x8x128xf32, #tpu.memory_space<vmem>>, vector<1x8x128xf32>
    %41 = vector.shape_cast %40 : vector<1x8x128xf32> to vector<8x128xf32>
    %42 = vector.shape_cast %38 : vector<8x128xf32> to vector<1x8x128xf32>
    tpu.vector_store %arg5[%39, %c0_12, %c0_13], %42 {strides = array<i32>} : memref<8x8x128xf32, #tpu.memory_space<vmem>>, vector<1x8x128xf32>,
    %c1_i32 = arith.constant 1 : i32
    %43 = arith.index_cast %c1_i32 : i32 to index
    %c0_14 = arith.constant 0 : index
    %c0_15 = arith.constant 0 : index
    %44 = vector.load %arg1[%43, %c0_14, %c0_15] : memref<8x8x128xbf16, #tpu.memory_space<vmem>>, vector<1x8x128xbf16>
    %45 = vector.shape_cast %44 : vector<1x8x128xbf16> to vector<8x128xbf16>
    %cst_16 = arith.constant dense<0.000000e+00> : vector<8x512xf32>
    %46 = tpu.matmul %45, %0, %cst_16 {dimension_numbers = #tpu.dot_dimension_numbers<[1], [0], [0], [1], [0, 0, 1, 1], [], []>} : vector<8x128xbf16>, vector<128x512xbf16>, vector<8x512xf32> -> vector<8x512xf32>
    %47 = arith.truncf %38 : vector<8x128xf32> to vector<8x128xbf16>
    %cst_17 = arith.constant dense<0.000000e+00> : vector<8x512xf32>
    %48 = tpu.matmul %47, %1, %cst_17 {dimension_numbers = #tpu.dot_dimension_numbers<[1], [0], [0], [1], [0, 0, 1, 1], [], []>} : vector<8x128xbf16>, vector<128x512xbf16>, vector<8x512xf32> -> vector<8x512xf32>
    %49 = arith.addf %46, %48 : vector<8x512xf32>
    %50 = arith.addf %49, %4 : vector<8x512xf32>
    %51 = vector.extract_strided_slice %50 {offsets = [0, 0], sizes = [8, 128], strides = [1, 1]} : vector<8x512xf32> to vector<8x128xf32>
    %52 = arith.negf %51 : vector<8x128xf32>
    %53 = math.exp %52 : vector<8x128xf32>
    %cst_18 = arith.constant 1.000000e+00 : f32
    %54 = vector.broadcast %cst_18 : f32 to vector<8x128xf32>
    %55 = arith.addf %54, %53 : vector<8x128xf32>
    %56 = arith.divf %54, %55 : vector<8x128xf32>
    %57 = vector.extract_strided_slice %50 {offsets = [0, 128], sizes = [8, 128], strides = [1, 1]} : vector<8x512xf32> to vector<8x128xf32>
    %58 = arith.negf %57 : vector<8x128xf32>
    %59 = math.exp %58 : vector<8x128xf32>
    %cst_19 = arith.constant 1.000000e+00 : f32
    %60 = vector.broadcast %cst_19 : f32 to vector<8x128xf32>
    %61 = arith.addf %60, %59 : vector<8x128xf32>
    %62 = arith.divf %60, %61 : vector<8x128xf32>
    %63 = vector.extract_strided_slice %50 {offsets = [0, 256], sizes = [8, 128], strides = [1, 1]} : vector<8x512xf32> to vector<8x128xf32>
    %64 = math.tanh %63 : vector<8x128xf32>
    %65 = vector.extract_strided_slice %50 {offsets = [0, 384], sizes = [8, 128], strides = [1, 1]} : vector<8x512xf32> to vector<8x128xf32>
    %66 = arith.negf %65 : vector<8x128xf32>
    %67 = math.exp %66 : vector<8x128xf32>
    %cst_20 = arith.constant 1.000000e+00 : f32
    %68 = vector.broadcast %cst_20 : f32 to vector<8x128xf32>
    %69 = arith.addf %68, %67 : vector<8x128xf32>
    %70 = arith.divf %68, %69 : vector<8x128xf32>
    %71 = arith.mulf %62, %36 : vector<8x128xf32>
    %72 = arith.mulf %56, %64 : vector<8x128xf32>
    %73 = arith.addf %71, %72 : vector<8x128xf32>
    %74 = math.tanh %73 : vector<8x128xf32>
    %75 = arith.mulf %70, %74 : vector<8x128xf32>
    %76 = arith.index_cast %c1_i32 : i32 to index
    %c0_21 = arith.constant 0 : index
    %c0_22 = arith.constant 0 : index
    %77 = vector.load %arg5[%76, %c0_21, %c0_22] : memref<8x8x128xf32, #tpu.memory_space<vmem>>, vector<1x8x128xf32>
    %78 = vector.shape_cast %77 : vector<1x8x128xf32> to vector<8x128xf32>
    %79 = vector.shape_cast %75 : vector<8x128xf32> to vector<1x8x128xf32>
    tpu.vector_store %arg5[%76, %c0_21, %c0_22], %79 {strides = array<i32>} : memref<8x8x128xf32, #tpu.memory_space<vmem>>, vector<1x8x128xf32>,
    %c2_i32 = arith.constant 2 : i32
    %80 = arith.index_cast %c2_i32 : i32 to index
    %c0_23 = arith.constant 0 : index
    %c0_24 = arith.constant 0 : index
    %81 = vector.load %arg1[%80, %c0_23, %c0_24] : memref<8x8x128xbf16, #tpu.memory_space<vmem>>, vector<1x8x128xbf16>
    %82 = vector.shape_cast %81 : vector<1x8x128xbf16> to vector<8x128xbf16>
    %cst_25 = arith.constant dense<0.000000e+00> : vector<8x512xf32>
    %83 = tpu.matmul %82, %0, %cst_25 {dimension_numbers = #tpu.dot_dimension_numbers<[1], [0], [0], [1], [0, 0, 1, 1], [], []>} : vector<8x128xbf16>, vector<128x512xbf16>, vector<8x512xf32> -> vector<8x512xf32>
    %84 = arith.truncf %75 : vector<8x128xf32> to vector<8x128xbf16>
    %cst_26 = arith.constant dense<0.000000e+00> : vector<8x512xf32>
    %85 = tpu.matmul %84, %1, %cst_26 {dimension_numbers = #tpu.dot_dimension_numbers<[1], [0], [0], [1], [0, 0, 1, 1], [], []>} : vector<8x128xbf16>, vector<128x512xbf16>, vector<8x512xf32> -> vector<8x512xf32>
    %86 = arith.addf %83, %85 : vector<8x512xf32>
    %87 = arith.addf %86, %4 : vector<8x512xf32>
    %88 = vector.extract_strided_slice %87 {offsets = [0, 0], sizes = [8, 128], strides = [1, 1]} : vector<8x512xf32> to vector<8x128xf32>
    %89 = arith.negf %88 : vector<8x128xf32>
    %90 = math.exp %89 : vector<8x128xf32>
    %cst_27 = arith.constant 1.000000e+00 : f32
    %91 = vector.broadcast %cst_27 : f32 to vector<8x128xf32>
    %92 = arith.addf %91, %90 : vector<8x128xf32>
    %93 = arith.divf %91, %92 : vector<8x128xf32>
    %94 = vector.extract_strided_slice %87 {offsets = [0, 128], sizes = [8, 128], strides = [1, 1]} : vector<8x512xf32> to vector<8x128xf32>
    %95 = arith.negf %94 : vector<8x128xf32>
    %96 = math.exp %95 : vector<8x128xf32>
    %cst_28 = arith.constant 1.000000e+00 : f32
    %97 = vector.broadcast %cst_28 : f32 to vector<8x128xf32>
    %98 = arith.addf %97, %96 : vector<8x128xf32>
    %99 = arith.divf %97, %98 : vector<8x128xf32>
    %100 = vector.extract_strided_slice %87 {offsets = [0, 256], sizes = [8, 128], strides = [1, 1]} : vector<8x512xf32> to vector<8x128xf32>
    %101 = math.tanh %100 : vector<8x128xf32>
    %102 = vector.extract_strided_slice %87 {offsets = [0, 384], sizes = [8, 128], strides = [1, 1]} : vector<8x512xf32> to vector<8x128xf32>
    %103 = arith.negf %102 : vector<8x128xf32>
    %104 = math.exp %103 : vector<8x128xf32>
    %cst_29 = arith.constant 1.000000e+00 : f32
    %105 = vector.broadcast %cst_29 : f32 to vector<8x128xf32>
    %106 = arith.addf %105, %104 : vector<8x128xf32>
    %107 = arith.divf %105, %106 : vector<8x128xf32>
    %108 = arith.mulf %99, %73 : vector<8x128xf32>
    %109 = arith.mulf %93, %101 : vector<8x128xf32>
    %110 = arith.addf %108, %109 : vector<8x128xf32>
    %111 = math.tanh %110 : vector<8x128xf32>
    %112 = arith.mulf %107, %111 : vector<8x128xf32>
    %113 = arith.index_cast %c2_i32 : i32 to index
    %c0_30 = arith.constant 0 : index
    %c0_31 = arith.constant 0 : index
    %114 = vector.load %arg5[%113, %c0_30, %c0_31] : memref<8x8x128xf32, #tpu.memory_space<vmem>>, vector<1x8x128xf32>
    %115 = vector.shape_cast %114 : vector<1x8x128xf32> to vector<8x128xf32>
    %116 = vector.shape_cast %112 : vector<8x128xf32> to vector<1x8x128xf32>
    tpu.vector_store %arg5[%113, %c0_30, %c0_31], %116 {strides = array<i32>} : memref<8x8x128xf32, #tpu.memory_space<vmem>>, vector<1x8x128xf32>,
    %c3_i32 = arith.constant 3 : i32
    %117 = arith.index_cast %c3_i32 : i32 to index
    %c0_32 = arith.constant 0 : index
    %c0_33 = arith.constant 0 : index
    %118 = vector.load %arg1[%117, %c0_32, %c0_33] : memref<8x8x128xbf16, #tpu.memory_space<vmem>>, vector<1x8x128xbf16>
    %119 = vector.shape_cast %118 : vector<1x8x128xbf16> to vector<8x128xbf16>
    %cst_34 = arith.constant dense<0.000000e+00> : vector<8x512xf32>
    %120 = tpu.matmul %119, %0, %cst_34 {dimension_numbers = #tpu.dot_dimension_numbers<[1], [0], [0], [1], [0, 0, 1, 1], [], []>} : vector<8x128xbf16>, vector<128x512xbf16>, vector<8x512xf32> -> vector<8x512xf32>
    %121 = arith.truncf %112 : vector<8x128xf32> to vector<8x128xbf16>
    %cst_35 = arith.constant dense<0.000000e+00> : vector<8x512xf32>
    %122 = tpu.matmul %121, %1, %cst_35 {dimension_numbers = #tpu.dot_dimension_numbers<[1], [0], [0], [1], [0, 0, 1, 1], [], []>} : vector<8x128xbf16>, vector<128x512xbf16>, vector<8x512xf32> -> vector<8x512xf32>
    %123 = arith.addf %120, %122 : vector<8x512xf32>
    %124 = arith.addf %123, %4 : vector<8x512xf32>
    %125 = vector.extract_strided_slice %124 {offsets = [0, 0], sizes = [8, 128], strides = [1, 1]} : vector<8x512xf32> to vector<8x128xf32>
    %126 = arith.negf %125 : vector<8x128xf32>
    %127 = math.exp %126 : vector<8x128xf32>
    %cst_36 = arith.constant 1.000000e+00 : f32
    %128 = vector.broadcast %cst_36 : f32 to vector<8x128xf32>
    %129 = arith.addf %128, %127 : vector<8x128xf32>
    %130 = arith.divf %128, %129 : vector<8x128xf32>
    %131 = vector.extract_strided_slice %124 {offsets = [0, 128], sizes = [8, 128], strides = [1, 1]} : vector<8x512xf32> to vector<8x128xf32>
    %132 = arith.negf %131 : vector<8x128xf32>
    %133 = math.exp %132 : vector<8x128xf32>
    %cst_37 = arith.constant 1.000000e+00 : f32
    %134 = vector.broadcast %cst_37 : f32 to vector<8x128xf32>
    %135 = arith.addf %134, %133 : vector<8x128xf32>
    %136 = arith.divf %134, %135 : vector<8x128xf32>
    %137 = vector.extract_strided_slice %124 {offsets = [0, 256], sizes = [8, 128], strides = [1, 1]} : vector<8x512xf32> to vector<8x128xf32>
    %138 = math.tanh %137 : vector<8x128xf32>
    %139 = vector.extract_strided_slice %124 {offsets = [0, 384], sizes = [8, 128], strides = [1, 1]} : vector<8x512xf32> to vector<8x128xf32>
    %140 = arith.negf %139 : vector<8x128xf32>
    %141 = math.exp %140 : vector<8x128xf32>
    %cst_38 = arith.constant 1.000000e+00 : f32
    %142 = vector.broadcast %cst_38 : f32 to vector<8x128xf32>
    %143 = arith.addf %142, %141 : vector<8x128xf32>
    %144 = arith.divf %142, %143 : vector<8x128xf32>
    %145 = arith.mulf %136, %110 : vector<8x128xf32>
    %146 = arith.mulf %130, %138 : vector<8x128xf32>
    %147 = arith.addf %145, %146 : vector<8x128xf32>
    %148 = math.tanh %147 : vector<8x128xf32>
    %149 = arith.mulf %144, %148 : vector<8x128xf32>
    %150 = arith.index_cast %c3_i32 : i32 to index
    %c0_39 = arith.constant 0 : index
    %c0_40 = arith.constant 0 : index
    %151 = vector.load %arg5[%150, %c0_39, %c0_40] : memref<8x8x128xf32, #tpu.memory_space<vmem>>, vector<1x8x128xf32>
    %152 = vector.shape_cast %151 : vector<1x8x128xf32> to vector<8x128xf32>
    %153 = vector.shape_cast %149 : vector<8x128xf32> to vector<1x8x128xf32>
    tpu.vector_store %arg5[%150, %c0_39, %c0_40], %153 {strides = array<i32>} : memref<8x8x128xf32, #tpu.memory_space<vmem>>, vector<1x8x128xf32>,
    %c4_i32 = arith.constant 4 : i32
    %154 = arith.index_cast %c4_i32 : i32 to index
    %c0_41 = arith.constant 0 : index
    %c0_42 = arith.constant 0 : index
    %155 = vector.load %arg1[%154, %c0_41, %c0_42] : memref<8x8x128xbf16, #tpu.memory_space<vmem>>, vector<1x8x128xbf16>
    %156 = vector.shape_cast %155 : vector<1x8x128xbf16> to vector<8x128xbf16>
    %cst_43 = arith.constant dense<0.000000e+00> : vector<8x512xf32>
    %157 = tpu.matmul %156, %0, %cst_43 {dimension_numbers = #tpu.dot_dimension_numbers<[1], [0], [0], [1], [0, 0, 1, 1], [], []>} : vector<8x128xbf16>, vector<128x512xbf16>, vector<8x512xf32> -> vector<8x512xf32>
    %158 = arith.truncf %149 : vector<8x128xf32> to vector<8x128xbf16>
    %cst_44 = arith.constant dense<0.000000e+00> : vector<8x512xf32>
    %159 = tpu.matmul %158, %1, %cst_44 {dimension_numbers = #tpu.dot_dimension_numbers<[1], [0], [0], [1], [0, 0, 1, 1], [], []>} : vector<8x128xbf16>, vector<128x512xbf16>, vector<8x512xf32> -> vector<8x512xf32>
    %160 = arith.addf %157, %159 : vector<8x512xf32>
    %161 = arith.addf %160, %4 : vector<8x512xf32>
    %162 = vector.extract_strided_slice %161 {offsets = [0, 0], sizes = [8, 128], strides = [1, 1]} : vector<8x512xf32> to vector<8x128xf32>
    %163 = arith.negf %162 : vector<8x128xf32>
    %164 = math.exp %163 : vector<8x128xf32>
    %cst_45 = arith.constant 1.000000e+00 : f32
    %165 = vector.broadcast %cst_45 : f32 to vector<8x128xf32>
    %166 = arith.addf %165, %164 : vector<8x128xf32>
    %167 = arith.divf %165, %166 : vector<8x128xf32>
    %168 = vector.extract_strided_slice %161 {offsets = [0, 128], sizes = [8, 128], strides = [1, 1]} : vector<8x512xf32> to vector<8x128xf32>
    %169 = arith.negf %168 : vector<8x128xf32>
    %170 = math.exp %169 : vector<8x128xf32>
    %cst_46 = arith.constant 1.000000e+00 : f32
    %171 = vector.broadcast %cst_46 : f32 to vector<8x128xf32>
    %172 = arith.addf %171, %170 : vector<8x128xf32>
    %173 = arith.divf %171, %172 : vector<8x128xf32>
    %174 = vector.extract_strided_slice %161 {offsets = [0, 256], sizes = [8, 128], strides = [1, 1]} : vector<8x512xf32> to vector<8x128xf32>
    %175 = math.tanh %174 : vector<8x128xf32>
    %176 = vector.extract_strided_slice %161 {offsets = [0, 384], sizes = [8, 128], strides = [1, 1]} : vector<8x512xf32> to vector<8x128xf32>
    %177 = arith.negf %176 : vector<8x128xf32>
    %178 = math.exp %177 : vector<8x128xf32>
    %cst_47 = arith.constant 1.000000e+00 : f32
    %179 = vector.broadcast %cst_47 : f32 to vector<8x128xf32>
    %180 = arith.addf %179, %178 : vector<8x128xf32>
    %181 = arith.divf %179, %180 : vector<8x128xf32>
    %182 = arith.mulf %173, %147 : vector<8x128xf32>
    %183 = arith.mulf %167, %175 : vector<8x128xf32>
    %184 = arith.addf %182, %183 : vector<8x128xf32>
    %185 = math.tanh %184 : vector<8x128xf32>
    %186 = arith.mulf %181, %185 : vector<8x128xf32>
    %187 = arith.index_cast %c4_i32 : i32 to index
    %c0_48 = arith.constant 0 : index
    %c0_49 = arith.constant 0 : index
    %188 = vector.load %arg5[%187, %c0_48, %c0_49] : memref<8x8x128xf32, #tpu.memory_space<vmem>>, vector<1x8x128xf32>
    %189 = vector.shape_cast %188 : vector<1x8x128xf32> to vector<8x128xf32>
    %190 = vector.shape_cast %186 : vector<8x128xf32> to vector<1x8x128xf32>
    tpu.vector_store %arg5[%187, %c0_48, %c0_49], %190 {strides = array<i32>} : memref<8x8x128xf32, #tpu.memory_space<vmem>>, vector<1x8x128xf32>,
    %c5_i32 = arith.constant 5 : i32
    %191 = arith.index_cast %c5_i32 : i32 to index
    %c0_50 = arith.constant 0 : index
    %c0_51 = arith.constant 0 : index
    %192 = vector.load %arg1[%191, %c0_50, %c0_51] : memref<8x8x128xbf16, #tpu.memory_space<vmem>>, vector<1x8x128xbf16>
    %193 = vector.shape_cast %192 : vector<1x8x128xbf16> to vector<8x128xbf16>
    %cst_52 = arith.constant dense<0.000000e+00> : vector<8x512xf32>
    %194 = tpu.matmul %193, %0, %cst_52 {dimension_numbers = #tpu.dot_dimension_numbers<[1], [0], [0], [1], [0, 0, 1, 1], [], []>} : vector<8x128xbf16>, vector<128x512xbf16>, vector<8x512xf32> -> vector<8x512xf32>
    %195 = arith.truncf %186 : vector<8x128xf32> to vector<8x128xbf16>
    %cst_53 = arith.constant dense<0.000000e+00> : vector<8x512xf32>
    %196 = tpu.matmul %195, %1, %cst_53 {dimension_numbers = #tpu.dot_dimension_numbers<[1], [0], [0], [1], [0, 0, 1, 1], [], []>} : vector<8x128xbf16>, vector<128x512xbf16>, vector<8x512xf32> -> vector<8x512xf32>
    %197 = arith.addf %194, %196 : vector<8x512xf32>
    %198 = arith.addf %197, %4 : vector<8x512xf32>
    %199 = vector.extract_strided_slice %198 {offsets = [0, 0], sizes = [8, 128], strides = [1, 1]} : vector<8x512xf32> to vector<8x128xf32>
    %200 = arith.negf %199 : vector<8x128xf32>
    %201 = math.exp %200 : vector<8x128xf32>
    %cst_54 = arith.constant 1.000000e+00 : f32
    %202 = vector.broadcast %cst_54 : f32 to vector<8x128xf32>
    %203 = arith.addf %202, %201 : vector<8x128xf32>
    %204 = arith.divf %202, %203 : vector<8x128xf32>
    %205 = vector.extract_strided_slice %198 {offsets = [0, 128], sizes = [8, 128], strides = [1, 1]} : vector<8x512xf32> to vector<8x128xf32>
    %206 = arith.negf %205 : vector<8x128xf32>
    %207 = math.exp %206 : vector<8x128xf32>
    %cst_55 = arith.constant 1.000000e+00 : f32
    %208 = vector.broadcast %cst_55 : f32 to vector<8x128xf32>
    %209 = arith.addf %208, %207 : vector<8x128xf32>
    %210 = arith.divf %208, %209 : vector<8x128xf32>
    %211 = vector.extract_strided_slice %198 {offsets = [0, 256], sizes = [8, 128], strides = [1, 1]} : vector<8x512xf32> to vector<8x128xf32>
    %212 = math.tanh %211 : vector<8x128xf32>
    %213 = vector.extract_strided_slice %198 {offsets = [0, 384], sizes = [8, 128], strides = [1, 1]} : vector<8x512xf32> to vector<8x128xf32>
    %214 = arith.negf %213 : vector<8x128xf32>
    %215 = math.exp %214 : vector<8x128xf32>
    %cst_56 = arith.constant 1.000000e+00 : f32
    %216 = vector.broadcast %cst_56 : f32 to vector<8x128xf32>
    %217 = arith.addf %216, %215 : vector<8x128xf32>
    %218 = arith.divf %216, %217 : vector<8x128xf32>
    %219 = arith.mulf %210, %184 : vector<8x128xf32>
    %220 = arith.mulf %204, %212 : vector<8x128xf32>
    %221 = arith.addf %219, %220 : vector<8x128xf32>
    %222 = math.tanh %221 : vector<8x128xf32>
    %223 = arith.mulf %218, %222 : vector<8x128xf32>
    %224 = arith.index_cast %c5_i32 : i32 to index
    %c0_57 = arith.constant 0 : index
    %c0_58 = arith.constant 0 : index
    %225 = vector.load %arg5[%224, %c0_57, %c0_58] : memref<8x8x128xf32, #tpu.memory_space<vmem>>, vector<1x8x128xf32>
    %226 = vector.shape_cast %225 : vector<1x8x128xf32> to vector<8x128xf32>
    %227 = vector.shape_cast %223 : vector<8x128xf32> to vector<1x8x128xf32>
    tpu.vector_store %arg5[%224, %c0_57, %c0_58], %227 {strides = array<i32>} : memref<8x8x128xf32, #tpu.memory_space<vmem>>, vector<1x8x128xf32>,
    %c6_i32 = arith.constant 6 : i32
    %228 = arith.index_cast %c6_i32 : i32 to index
    %c0_59 = arith.constant 0 : index
    %c0_60 = arith.constant 0 : index
    %229 = vector.load %arg1[%228, %c0_59, %c0_60] : memref<8x8x128xbf16, #tpu.memory_space<vmem>>, vector<1x8x128xbf16>
    %230 = vector.shape_cast %229 : vector<1x8x128xbf16> to vector<8x128xbf16>
    %cst_61 = arith.constant dense<0.000000e+00> : vector<8x512xf32>
    %231 = tpu.matmul %230, %0, %cst_61 {dimension_numbers = #tpu.dot_dimension_numbers<[1], [0], [0], [1], [0, 0, 1, 1], [], []>} : vector<8x128xbf16>, vector<128x512xbf16>, vector<8x512xf32> -> vector<8x512xf32>
    %232 = arith.truncf %223 : vector<8x128xf32> to vector<8x128xbf16>
    %cst_62 = arith.constant dense<0.000000e+00> : vector<8x512xf32>
    %233 = tpu.matmul %232, %1, %cst_62 {dimension_numbers = #tpu.dot_dimension_numbers<[1], [0], [0], [1], [0, 0, 1, 1], [], []>} : vector<8x128xbf16>, vector<128x512xbf16>, vector<8x512xf32> -> vector<8x512xf32>
    %234 = arith.addf %231, %233 : vector<8x512xf32>
    %235 = arith.addf %234, %4 : vector<8x512xf32>
    %236 = vector.extract_strided_slice %235 {offsets = [0, 0], sizes = [8, 128], strides = [1, 1]} : vector<8x512xf32> to vector<8x128xf32>
    %237 = arith.negf %236 : vector<8x128xf32>
    %238 = math.exp %237 : vector<8x128xf32>
    %cst_63 = arith.constant 1.000000e+00 : f32
    %239 = vector.broadcast %cst_63 : f32 to vector<8x128xf32>
    %240 = arith.addf %239, %238 : vector<8x128xf32>
    %241 = arith.divf %239, %240 : vector<8x128xf32>
    %242 = vector.extract_strided_slice %235 {offsets = [0, 128], sizes = [8, 128], strides = [1, 1]} : vector<8x512xf32> to vector<8x128xf32>
    %243 = arith.negf %242 : vector<8x128xf32>
    %244 = math.exp %243 : vector<8x128xf32>
    %cst_64 = arith.constant 1.000000e+00 : f32
    %245 = vector.broadcast %cst_64 : f32 to vector<8x128xf32>
    %246 = arith.addf %245, %244 : vector<8x128xf32>
    %247 = arith.divf %245, %246 : vector<8x128xf32>
    %248 = vector.extract_strided_slice %235 {offsets = [0, 256], sizes = [8, 128], strides = [1, 1]} : vector<8x512xf32> to vector<8x128xf32>
    %249 = math.tanh %248 : vector<8x128xf32>
    %250 = vector.extract_strided_slice %235 {offsets = [0, 384], sizes = [8, 128], strides = [1, 1]} : vector<8x512xf32> to vector<8x128xf32>
    %251 = arith.negf %250 : vector<8x128xf32>
    %252 = math.exp %251 : vector<8x128xf32>
    %cst_65 = arith.constant 1.000000e+00 : f32
    %253 = vector.broadcast %cst_65 : f32 to vector<8x128xf32>
    %254 = arith.addf %253, %252 : vector<8x128xf32>
    %255 = arith.divf %253, %254 : vector<8x128xf32>
    %256 = arith.mulf %247, %221 : vector<8x128xf32>
    %257 = arith.mulf %241, %249 : vector<8x128xf32>
    %258 = arith.addf %256, %257 : vector<8x128xf32>
    %259 = math.tanh %258 : vector<8x128xf32>
    %260 = arith.mulf %255, %259 : vector<8x128xf32>
    %261 = arith.index_cast %c6_i32 : i32 to index
    %c0_66 = arith.constant 0 : index
    %c0_67 = arith.constant 0 : index
    %262 = vector.load %arg5[%261, %c0_66, %c0_67] : memref<8x8x128xf32, #tpu.memory_space<vmem>>, vector<1x8x128xf32>
    %263 = vector.shape_cast %262 : vector<1x8x128xf32> to vector<8x128xf32>
    %264 = vector.shape_cast %260 : vector<8x128xf32> to vector<1x8x128xf32>
    tpu.vector_store %arg5[%261, %c0_66, %c0_67], %264 {strides = array<i32>} : memref<8x8x128xf32, #tpu.memory_space<vmem>>, vector<1x8x128xf32>,
    %c7_i32 = arith.constant 7 : i32
    %265 = arith.index_cast %c7_i32 : i32 to index
    %c0_68 = arith.constant 0 : index
    %c0_69 = arith.constant 0 : index
    %266 = vector.load %arg1[%265, %c0_68, %c0_69] : memref<8x8x128xbf16, #tpu.memory_space<vmem>>, vector<1x8x128xbf16>
    %267 = vector.shape_cast %266 : vector<1x8x128xbf16> to vector<8x128xbf16>
    %cst_70 = arith.constant dense<0.000000e+00> : vector<8x512xf32>
    %268 = tpu.matmul %267, %0, %cst_70 {dimension_numbers = #tpu.dot_dimension_numbers<[1], [0], [0], [1], [0, 0, 1, 1], [], []>} : vector<8x128xbf16>, vector<128x512xbf16>, vector<8x512xf32> -> vector<8x512xf32>
    %269 = arith.truncf %260 : vector<8x128xf32> to vector<8x128xbf16>
    %cst_71 = arith.constant dense<0.000000e+00> : vector<8x512xf32>
    %270 = tpu.matmul %269, %1, %cst_71 {dimension_numbers = #tpu.dot_dimension_numbers<[1], [0], [0], [1], [0, 0, 1, 1], [], []>} : vector<8x128xbf16>, vector<128x512xbf16>, vector<8x512xf32> -> vector<8x512xf32>
    %271 = arith.addf %268, %270 : vector<8x512xf32>
    %272 = arith.addf %271, %4 : vector<8x512xf32>
    %273 = vector.extract_strided_slice %272 {offsets = [0, 0], sizes = [8, 128], strides = [1, 1]} : vector<8x512xf32> to vector<8x128xf32>
    %274 = arith.negf %273 : vector<8x128xf32>
    %275 = math.exp %274 : vector<8x128xf32>
    %cst_72 = arith.constant 1.000000e+00 : f32
    %276 = vector.broadcast %cst_72 : f32 to vector<8x128xf32>
    %277 = arith.addf %276, %275 : vector<8x128xf32>
    %278 = arith.divf %276, %277 : vector<8x128xf32>
    %279 = vector.extract_strided_slice %272 {offsets = [0, 128], sizes = [8, 128], strides = [1, 1]} : vector<8x512xf32> to vector<8x128xf32>
    %280 = arith.negf %279 : vector<8x128xf32>
    %281 = math.exp %280 : vector<8x128xf32>
    %cst_73 = arith.constant 1.000000e+00 : f32
    %282 = vector.broadcast %cst_73 : f32 to vector<8x128xf32>
    %283 = arith.addf %282, %281 : vector<8x128xf32>
    %284 = arith.divf %282, %283 : vector<8x128xf32>
    %285 = vector.extract_strided_slice %272 {offsets = [0, 256], sizes = [8, 128], strides = [1, 1]} : vector<8x512xf32> to vector<8x128xf32>
    %286 = math.tanh %285 : vector<8x128xf32>
    %287 = vector.extract_strided_slice %272 {offsets = [0, 384], sizes = [8, 128], strides = [1, 1]} : vector<8x512xf32> to vector<8x128xf32>
    %288 = arith.negf %287 : vector<8x128xf32>
    %289 = math.exp %288 : vector<8x128xf32>
    %cst_74 = arith.constant 1.000000e+00 : f32
    %290 = vector.broadcast %cst_74 : f32 to vector<8x128xf32>
    %291 = arith.addf %290, %289 : vector<8x128xf32>
    %292 = arith.divf %290, %291 : vector<8x128xf32>
    %293 = arith.mulf %284, %258 : vector<8x128xf32>
    %294 = arith.mulf %278, %286 : vector<8x128xf32>
    %295 = arith.addf %293, %294 : vector<8x128xf32>
    %296 = math.tanh %295 : vector<8x128xf32>
    %297 = arith.mulf %292, %296 : vector<8x128xf32>
    %298 = arith.index_cast %c7_i32 : i32 to index
    %c0_75 = arith.constant 0 : index
    %c0_76 = arith.constant 0 : index
    %299 = vector.load %arg5[%298, %c0_75, %c0_76] : memref<8x8x128xf32, #tpu.memory_space<vmem>>, vector<1x8x128xf32>
    %300 = vector.shape_cast %299 : vector<1x8x128xf32> to vector<8x128xf32>
    %301 = vector.shape_cast %297 : vector<8x128xf32> to vector<1x8x128xf32>
    tpu.vector_store %arg5[%298, %c0_75, %c0_76], %301 {strides = array<i32>} : memref<8x8x128xf32, #tpu.memory_space<vmem>>, vector<1x8x128xf32>,
    %c8_i32 = arith.constant 8 : i32
    return
  }
  func.func @transform_0(%arg0: i32) -> (i32, i32, i32) {
    %c0_i32 = arith.constant 0 : i32
    %c0_i32_0 = arith.constant 0 : i32
    %c0_i32_1 = arith.constant 0 : i32
    %c0_i32_2 = arith.constant 0 : i32
    return %c0_i32, %c0_i32_0, %c0_i32_1 : i32, i32, i32
  }
  func.func @transform_1(%arg0: i32) -> (i32, i32) {
    %c0_i32 = arith.constant 0 : i32
    %c0_i32_0 = arith.constant 0 : i32
    %c0_i32_1 = arith.constant 0 : i32
    return %c0_i32, %c0_i32_0 : i32, i32
  }
  func.func @transform_2(%arg0: i32) -> (i32, i32) {
    %c0_i32 = arith.constant 0 : i32
    %c0_i32_0 = arith.constant 0 : i32
    %c0_i32_1 = arith.constant 0 : i32
    return %c0_i32, %c0_i32_0 : i32, i32
  }
  func.func @transform_3(%arg0: i32) -> (i32, i32) {
    %c0_i32 = arith.constant 0 : i32
    %c0_i32_0 = arith.constant 0 : i32
    %c0_i32_1 = arith.constant 0 : i32
    return %c0_i32, %c0_i32_0 : i32, i32
  }
  func.func @transform_4(%arg0: i32) -> (i32, i32, i32) {
    %c0_i32 = arith.constant 0 : i32
    %c0_i32_0 = arith.constant 0 : i32
    %c0_i32_1 = arith.constant 0 : i32
    %c0_i32_2 = arith.constant 0 : i32
    return %c0_i32, %c0_i32_0, %c0_i32_1 : i32, i32, i32
  }
}

</mosaic_0001>

<bundles_post_ra>
// kernel: tpu_custom_call.1
= control target key start
LH: loop header
LB: loop body
LE: loop exit
PB: predicated region body
PF: predicated region fallthrough
CT: control target
= control target key end

     0   :  { %9 = vsyncpa [#allocation3], 0  ;;  %s3501_s0 = inlined_call_operand.hbm [shape: bf16[8,8,128], index: 0, kind: input, shape index: {}]   ;;  %s3502_s1 = inlined_call_operand.hbm [shape: bf16[128,512], index: 1, kind: input, shape index: {}]   ;;  %s3503_s2 = inlined_call_operand.hbm [shape: bf16[128,512], index: 2, kind: input, shape index: {}]   ;;  %s3504_s3 = inlined_call_operand.vmem [shape: f32[1,512], index: 3, kind: input, shape index: {}]   ;;  %s3505_s4 = inlined_call_operand.hbm [shape: f32[8,8,128], index: 4, kind: output, shape index: {}]  }
   0x1   :  { %10 = vsyncpa [#allocation6], 0 }
   0x2   :  { %11 = vsyncpa [#allocation4], 0  ;;  %s2538_s15 = smov [#allocation5]   ;;  %s2444_s19 = scalar_lea.hbm %s3502_s1, 4096 }
   0x3   :  { %s29_s16 = sshll.u32 %s2538_s15, 4  ;;  %p2445_p0 = scmp.ne.s32.totalorder %s3502_s1, %s2444_s19  ;;  %s30_s16 = int_to_ptr.vmem [resolvable:$true] %s29_s16 }
   0x4   :  { %p2448_p1 = scmp.lt.u32.totalorder %s2444_s19, %s3502_s1 }
   0x6   :  { %p2450_p2 = pnand %p2448_p1, %p2445_p0 }
   0x8   :  { %2453 = shalt.err (!%p2450_p2)
}
   0x9   :  { %s2454_s24 = scalar_lea.vmem %s30_s16, 4096  ;;  %p2459_p4 = scmp.lt.s32.totalorder %s30_s16, %s30_s16 }
   0xa   :  { %p2455_p3 = scmp.ne.s32.totalorder %s30_s16, %s2454_s24  ;;  %p2460_p5 = scmp.lt.s32.totalorder %s2454_s24, %s2454_s24 }
   0xc   :  { %p2461_p6 = por %p2460_p5, %p2459_p4 }
   0xe   :  { %p2462_p7 = pnand %p2461_p6, %p2455_p3 }
  0x10   :  { %2465 = shalt.err (!%p2462_p7)
}
  0x11   :  { %s2539_s25 = smov 256   ;;  %s2540_s26 = smov 16  }
  0x12   :  { %35 = dma.hbm_to_vmem [thread:$0]  %s3502_s1, 4096, %s30_s16, [#allocation6], %s2539_s25, %s2539_s25, %s2540_s26  }
  0x13   :  { %s2541_s29 = smov [#allocation2]   ;;  %s2466_s7 = scalar_lea.hbm %s3501_s0, 512 }
  0x14   :  { %s17_s30 = sshll.u32 %s2541_s29, 4  ;;  %p2467_p8 = scmp.ne.s32.totalorder %s3501_s0, %s2466_s7  ;;  %s18_s30 = int_to_ptr.vmem [resolvable:$true] %s17_s30 }
  0x15   :  { %p2470_p9 = scmp.lt.u32.totalorder %s2466_s7, %s3501_s0 }
  0x17   :  { %p2472_p10 = pnand %p2470_p9, %p2467_p8 }
  0x19   :  { %2475 = shalt.err (!%p2472_p10)
}
  0x1a   :  { %s2476_s12 = scalar_lea.vmem %s18_s30, 512  ;;  %p2481_p12 = scmp.lt.s32.totalorder %s18_s30, %s18_s30 }
  0x1b   :  { %p2477_p11 = scmp.ne.s32.totalorder %s18_s30, %s2476_s12  ;;  %p2482_p13 = scmp.lt.s32.totalorder %s2476_s12, %s2476_s12 }
  0x1d   :  { %p2483_p0 = por %p2482_p13, %p2481_p12 }
  0x1f   :  { %p2484_p1 = pnand %p2483_p0, %p2477_p11 }
  0x21   :  { %2487 = shalt.err (!%p2484_p1)
}
  0x22   :  { %s2542_s1 = smov 64   ;;  %s2543_s13 = smov 4  }
  0x23   :  { %23 = dma.hbm_to_vmem [thread:$0]  %s3501_s0, 512, %s18_s30, [#allocation3], %s2542_s1, %s2542_s1, %s2543_s13  }
  0x24   :  { %s2544_s16 = smov [#allocation7]   ;;  %s2488_s20 = scalar_lea.hbm %s3503_s2, 4096 }
  0x25   :  { %s41_s17 = sshll.u32 %s2544_s16, 4  ;;  %p2489_p2 = scmp.ne.s32.totalorder %s3503_s2, %s2488_s20  ;;  %s42_s17 = int_to_ptr.vmem [resolvable:$true] %s41_s17 }
  0x26   :  { %p2492_p3 = scmp.lt.u32.totalorder %s2488_s20, %s3503_s2 }
  0x28   :  { %p2494_p4 = pnand %p2492_p3, %p2489_p2 }
  0x2a   :  { %2497 = shalt.err (!%p2494_p4)
}
  0x2b   :  { %s2498_s27 = scalar_lea.vmem %s42_s17, 4096  ;;  %p2503_p6 = scmp.lt.s32.totalorder %s42_s17, %s42_s17 }
  0x2c   :  { %p2499_p5 = scmp.ne.s32.totalorder %s42_s17, %s2498_s27  ;;  %p2504_p7 = scmp.lt.s32.totalorder %s2498_s27, %s2498_s27 }
  0x2e   :  { %p2505_p8 = por %p2504_p7, %p2503_p6 }
  0x30   :  { %p2506_p9 = pnand %p2505_p8, %p2499_p5 }
  0x32   :  { %2509 = shalt.err (!%p2506_p9)
}
  0x33   :  { %47 = dma.hbm_to_vmem [thread:$0]  %s3503_s2, 4096, %s42_s17, [#allocation6], %s2539_s25, %s2539_s25, %s2540_s26  }
  0x34   :  { %2532 = dma.done.wait [#allocation3], 512  }
  0x35   :  { %2533 = vsyncadd [#allocation3], 4294966784 }
  0x36   :  { %2534 = dma.done.wait [#allocation6], 8192  }
  0x37   :  { %2535 = vsyncadd [#allocation6], 4294959104  ;;  %v3506_v0 = vmov 0   ;;  %v2618_v1 = vld [vmem:[#allocation7 + $0x4] ss:$16 sps:$4 sm:$0xff]  }
  0x38   :  { %339 = vmatprep.mubr.bf16.mxu0 %v3506_v0  ;;  %380 = vmatprep.mubr.bf16.mxu1 %v3506_v0  ;;  %v2620_v2 = vld [vmem:[#allocation7 + $0xc] ss:$16 sps:$4 sm:$0xff]   ;;  %v2623_v3 = vld [vmem:[#allocation7] ss:$16 sps:$4 sm:$0xff]   ;;  %v2625_v4 = vld [vmem:[#allocation7 + $0x8] ss:$16 sps:$4 sm:$0xff]  }
  0x39   :  { %307 = vmatprep.subr.bf16.mxu0 %v2618_v1  ;;  %348 = vmatprep.subr.bf16.mxu1 %v2620_v2  ;;  %v2628_v5 = vld [vmem:[#allocation7 + $0x24] ss:$16 sps:$4 sm:$0xff]   ;;  %v2632_v6 = vld [vmem:[#allocation7 + $0x2c] ss:$16 sps:$4 sm:$0xff]   ;;  %v2634_v7 = vld [vmem:[#allocation7 + $0x20] ss:$16 sps:$4 sm:$0xff]  }
  0x3a   :  { %308 = vmatpush1.bf16.msra.mxu0 %v2623_v3  ;;  %349 = vmatpush1.bf16.msra.mxu1 %v2625_v4  ;;  %3629 = vst [vmem:[#allocation12_spill] sm:$0xff] %v2634_v7  ;;  %v2637_v8 = vld [vmem:[#allocation7 + $0x28] ss:$16 sps:$4 sm:$0xff]   ;;  %v2640_v9 = vld [vmem:[#allocation7 + $0x44] ss:$16 sps:$4 sm:$0xff]  }
  0x3b   :  { %309 = vmatprep.subr.bf16.mxu0 %v2628_v5  ;;  %3630 = vst [vmem:[#allocation13_spill] sm:$0xff] %v2637_v8  ;;  %350 = vmatprep.subr.bf16.mxu1 %v2632_v6  ;;  %3631 = vst [vmem:[#allocation14_spill] sm:$0xff] %v2640_v9  ;;  %v2642_v10 = vld [vmem:[#allocation7 + $0x4c] ss:$16 sps:$4 sm:$0xff]   ;;  %v2644_v11 = vld [vmem:[#allocation7 + $0x40] ss:$16 sps:$4 sm:$0xff]  }
  0x3c   :  { %3632 = vst [vmem:[#allocation15_spill] sm:$0xff] %v2642_v10  ;;  %3633 = vst [vmem:[#allocation16_spill] sm:$0xff] %v2644_v11  ;;  %v2646_v12 = vld [vmem:[#allocation7 + $0x48] ss:$16 sps:$4 sm:$0xff]   ;;  %v2650_v13 = vld [vmem:[#allocation7 + $0x64] ss:$16 sps:$4 sm:$0xff]  }
  0x3d   :  { %3634 = vst [vmem:[#allocation17_spill] sm:$0xff] %v2646_v12  ;;  %3635 = vst [vmem:[#allocation18_spill] sm:$0xff] %v2650_v13  ;;  %v2654_v14 = vld [vmem:[#allocation7 + $0x6c] ss:$16 sps:$4 sm:$0xff]   ;;  %v2656_v15 = vld [vmem:[#allocation7 + $0x60] ss:$16 sps:$4 sm:$0xff]  }
  0x3e   :  { %310 = vmatpush1.bf16.msra.mxu0 %v2634_v7  ;;  %351 = vmatpush1.bf16.msra.mxu1 %v2637_v8  ;;  %3636 = vst [vmem:[#allocation19_spill] sm:$0xff] %v2654_v14  ;;  %3637 = vst [vmem:[#allocation20_spill] sm:$0xff] %v2656_v15  ;;  %v2660_v16 = vld [vmem:[#allocation7 + $0x68] ss:$16 sps:$4 sm:$0xff]   ;;  %v2662_v17 = vld [vmem:[#allocation7 + $0x84] ss:$16 sps:$4 sm:$0xff]  }
  0x3f   :  { %311 = vmatprep.subr.bf16.mxu0 %v2640_v9  ;;  %352 = vmatprep.subr.bf16.mxu1 %v2642_v10  ;;  %3638 = vst [vmem:[#allocation21_spill] sm:$0xff] %v2660_v16  ;;  %3639 = vst [vmem:[#allocation22_spill] sm:$0xff] %v2662_v17  ;;  %v2666_v18 = vld [vmem:[#allocation7 + $0x8c] ss:$16 sps:$4 sm:$0xff]   ;;  %v2668_v19 = vld [vmem:[#allocation7 + $0x80] ss:$16 sps:$4 sm:$0xff]  }
  0x40   :  { %3640 = vst [vmem:[#allocation23_spill] sm:$0xff] %v2666_v18  ;;  %3641 = vst [vmem:[#allocation24_spill] sm:$0xff] %v2668_v19  ;;  %v2670_v20 = vld [vmem:[#allocation7 + $0x88] ss:$16 sps:$4 sm:$0xff]   ;;  %v2674_v21 = vld [vmem:[#allocation7 + $0xa4] ss:$16 sps:$4 sm:$0xff]  }
  0x41   :  { %3642 = vst [vmem:[#allocation25_spill] sm:$0xff] %v2670_v20  ;;  %3643 = vst [vmem:[#allocation26_spill] sm:$0xff] %v2674_v21  ;;  %v2678_v22 = vld [vmem:[#allocation7 + $0xac] ss:$16 sps:$4 sm:$0xff]   ;;  %v2680_v23 = vld [vmem:[#allocation7 + $0xa0] ss:$16 sps:$4 sm:$0xff]  }
  0x42   :  { %312 = vmatpush1.bf16.msra.mxu0 %v2644_v11  ;;  %353 = vmatpush1.bf16.msra.mxu1 %v2646_v12  ;;  %3644 = vst [vmem:[#allocation27_spill] sm:$0xff] %v2678_v22  ;;  %3645 = vst [vmem:[#allocation28_spill] sm:$0xff] %v2680_v23  ;;  %v2684_v24 = vld [vmem:[#allocation7 + $0xa8] ss:$16 sps:$4 sm:$0xff]   ;;  %v2686_v25 = vld [vmem:[#allocation7 + $0xc4] ss:$16 sps:$4 sm:$0xff]  }
  0x43   :  { %313 = vmatprep.subr.bf16.mxu0 %v2650_v13  ;;  %354 = vmatprep.subr.bf16.mxu1 %v2654_v14  ;;  %3646 = vst [vmem:[#allocation29_spill] sm:$0xff] %v2684_v24  ;;  %3647 = vst [vmem:[#allocation30_spill] sm:$0xff] %v2686_v25  ;;  %v2690_v26 = vld [vmem:[#allocation7 + $0xcc] ss:$16 sps:$4 sm:$0xff]   ;;  %v2692_v27 = vld [vmem:[#allocation7 + $0xc0] ss:$16 sps:$4 sm:$0xff]  }
  0x44   :  { %3648 = vst [vmem:[#allocation31_spill] sm:$0xff] %v2690_v26  ;;  %3649 = vst [vmem:[#allocation32_spill] sm:$0xff] %v2692_v27  ;;  %v2694_v28 = vld [vmem:[#allocation7 + $0xc8] ss:$16 sps:$4 sm:$0xff]   ;;  %v2698_v29 = vld [vmem:[#allocation7 + $0xe4] ss:$16 sps:$4 sm:$0xff]  }
  0x45   :  { %3650 = vst [vmem:[#allocation33_spill] sm:$0xff] %v2694_v28  ;;  %3651 = vst [vmem:[#allocation34_spill] sm:$0xff] %v2698_v29  ;;  %v2702_v30 = vld [vmem:[#allocation7 + $0xec] ss:$16 sps:$4 sm:$0xff]   ;;  %v2704_v31 = vld [vmem:[#allocation7 + $0xe0] ss:$16 sps:$4 sm:$0xff]  }
  0x46   :  { %314 = vmatpush1.bf16.msra.mxu0 %v2656_v15  ;;  %355 = vmatpush1.bf16.msra.mxu1 %v2660_v16  ;;  %3652 = vst [vmem:[#allocation35_spill] sm:$0xff] %v2702_v30  ;;  %3653 = vst [vmem:[#allocation36_spill] sm:$0xff] %v2704_v31  ;;  %v2708_v32 = vld [vmem:[#allocation7 + $0xe8] ss:$16 sps:$4 sm:$0xff]   ;;  %v2710_v33 = vld [vmem:[#allocation5 + $0x4] ss:$16 sps:$4 sm:$0xff]  }
  0x47   :  { %315 = vmatprep.subr.bf16.mxu0 %v2662_v17  ;;  %356 = vmatprep.subr.bf16.mxu1 %v2666_v18  ;;  %3654 = vst [vmem:[#allocation37_spill] sm:$0xff] %v2708_v32  ;;  %3655 = vst [vmem:[#allocation38_spill] sm:$0xff] %v2710_v33  ;;  %v2714_v34 = vld [vmem:[#allocation5 + $0xc] ss:$16 sps:$4 sm:$0xff]   ;;  %v2716_v35 = vld [vmem:[#allocation5] ss:$16 sps:$4 sm:$0xff]  }
  0x48   :  { %3656 = vst [vmem:[#allocation39_spill] sm:$0xff] %v2714_v34  ;;  %v2718_v36 = vld [vmem:[#allocation5 + $0x8] ss:$16 sps:$4 sm:$0xff]   ;;  %v2722_v37 = vld [vmem:[#allocation5 + $0x24] ss:$16 sps:$4 sm:$0xff]  }
  0x49   :  { %v2726_v38 = vld [vmem:[#allocation5 + $0x2c] ss:$16 sps:$4 sm:$0xff]   ;;  %v2730_v39 = vld [vmem:[#allocation5 + $0x20] ss:$16 sps:$4 sm:$0xff]   ;;  %v2734_v40 = vld [vmem:[#allocation5 + $0x28] ss:$16 sps:$4 sm:$0xff]  }
  0x4a   :  { %316 = vmatpush1.bf16.msra.mxu0 %v2668_v19  ;;  %357 = vmatpush1.bf16.msra.mxu1 %v2670_v20  ;;  %v2736_v41 = vld [vmem:[#allocation5 + $0x44] ss:$16 sps:$4 sm:$0xff]   ;;  %v2740_v42 = vld [vmem:[#allocation5 + $0x4c] ss:$16 sps:$4 sm:$0xff]   ;;  %v2744_v43 = vld [vmem:[#allocation5 + $0x40] ss:$16 sps:$4 sm:$0xff]  }
  0x4b   :  { %317 = vmatprep.subr.bf16.mxu0 %v2674_v21  ;;  %358 = vmatprep.subr.bf16.mxu1 %v2678_v22  ;;  %v2746_v44 = vld [vmem:[#allocation5 + $0x48] ss:$16 sps:$4 sm:$0xff]   ;;  %v2750_v45 = vld [vmem:[#allocation5 + $0x64] ss:$16 sps:$4 sm:$0xff]   ;;  %v2754_v46 = vld [vmem:[#allocation5 + $0x6c] ss:$16 sps:$4 sm:$0xff]  }
  0x4c   :  { %v2758_v47 = vld [vmem:[#allocation5 + $0x60] ss:$16 sps:$4 sm:$0xff]   ;;  %v2760_v48 = vld [vmem:[#allocation5 + $0x68] ss:$16 sps:$4 sm:$0xff]   ;;  %v2764_v49 = vld [vmem:[#allocation5 + $0x84] ss:$16 sps:$4 sm:$0xff]  }
  0x4d   :  { %v2766_v50 = vld [vmem:[#allocation5 + $0x8c] ss:$16 sps:$4 sm:$0xff]   ;;  %v2770_v51 = vld [vmem:[#allocation5 + $0x80] ss:$16 sps:$4 sm:$0xff]   ;;  %v2772_v52 = vld [vmem:[#allocation5 + $0x88] ss:$16 sps:$4 sm:$0xff]  }
  0x4e   :  { %318 = vmatpush1.bf16.msra.mxu0 %v2680_v23  ;;  %359 = vmatpush1.bf16.msra.mxu1 %v2684_v24  ;;  %v2776_v53 = vld [vmem:[#allocation5 + $0xa4] ss:$16 sps:$4 sm:$0xff]   ;;  %v2778_v54 = vld [vmem:[#allocation5 + $0xac] ss:$16 sps:$4 sm:$0xff]   ;;  %v2782_v55 = vld [vmem:[#allocation5 + $0xa0] ss:$16 sps:$4 sm:$0xff]  }
  0x4f   :  { %319 = vmatprep.subr.bf16.mxu0 %v2686_v25  ;;  %360 = vmatprep.subr.bf16.mxu1 %v2690_v26  ;;  %v2784_v56 = vld [vmem:[#allocation5 + $0xa8] ss:$16 sps:$4 sm:$0xff]   ;;  %v2788_v57 = vld [vmem:[#allocation5 + $0xc4] ss:$16 sps:$4 sm:$0xff]   ;;  %v2790_v58 = vld [vmem:[#allocation5 + $0xcc] ss:$16 sps:$4 sm:$0xff]  }
  0x50   :  { %3657 = vst [vmem:[#allocation40_spill] sm:$0xff] %v2790_v58  ;;  %v2794_v59 = vld [vmem:[#allocation5 + $0xc0] ss:$16 sps:$4 sm:$0xff]   ;;  %v2796_v60 = vld [vmem:[#allocation5 + $0xc8] ss:$16 sps:$4 sm:$0xff]  }
  0x51   :  { %v2800_v61 = vld [vmem:[#allocation5 + $0xe4] ss:$16 sps:$4 sm:$0xff]   ;;  %v2802_v62 = vld [vmem:[#allocation5 + $0xec] ss:$16 sps:$4 sm:$0xff]   ;;  %v2806_v63 = vld [vmem:[#allocation5 + $0xe0] ss:$16 sps:$4 sm:$0xff]  }
  0x52   :  { %320 = vmatpush1.bf16.msra.mxu0 %v2692_v27  ;;  %361 = vmatpush1.bf16.msra.mxu1 %v2694_v28  ;;  %3658 = vst [vmem:[#allocation41_spill] sm:$0xff] %v2802_v62 }
  0x53   :  { %321 = vmatprep.subr.bf16.mxu0 %v2698_v29  ;;  %362 = vmatprep.subr.bf16.mxu1 %v2702_v30 }
  0x56   :  { %322 = vmatpush1.bf16.msra.mxu0 %v2704_v31  ;;  %363 = vmatpush1.bf16.msra.mxu1 %v2708_v32 }
  0x57   :  { %549 = vmatprep.subr.bf16.mxu0 %v2710_v33  ;;  %590 = vmatprep.subr.bf16.mxu1 %v2714_v34 }
  0x59   :  { %340 = vmatmul.mubr.bf16.vlgmr.msra.gmra.mrb[0].mxu0 %v3506_v0  ;;  %381 = vmatmul.mubr.bf16.vlgmr.msra.gmra.mrb[0].mxu1 %v3506_v0 }
  0x5a   :  { %550 = vmatpush1.bf16.msra.mxu0 %v2716_v35  ;;  %591 = vmatpush1.bf16.msra.mxu1 %v2718_v36 }
  0x5b   :  { %551 = vmatprep.subr.bf16.mxu0 %v2722_v37  ;;  %592 = vmatprep.subr.bf16.mxu1 %v2726_v38 }
  0x5c   :  { %581 = vmatprep.mubr.bf16.mxu0 %v3506_v0  ;;  %622 = vmatprep.mubr.bf16.mxu1 %v3506_v0  ;;  %v2808_v0 = vld [vmem:[#allocation5 + $0xe8] ss:$16 sps:$4 sm:$0xff]  }
  0x5e   :  { %552 = vmatpush1.bf16.msra.mxu0 %v2730_v39  ;;  %593 = vmatpush1.bf16.msra.mxu1 %v2734_v40 }
  0x5f   :  { %553 = vmatprep.subr.bf16.mxu0 %v2736_v41  ;;  %594 = vmatprep.subr.bf16.mxu1 %v2740_v42 }
  0x62   :  { %554 = vmatpush1.bf16.msra.mxu0 %v2744_v43  ;;  %595 = vmatpush1.bf16.msra.mxu1 %v2746_v44 }
  0x63   :  { %555 = vmatprep.subr.bf16.mxu0 %v2750_v45  ;;  %596 = vmatprep.subr.bf16.mxu1 %v2754_v46 }
  0x66   :  { %556 = vmatpush1.bf16.msra.mxu0 %v2758_v47  ;;  %597 = vmatpush1.bf16.msra.mxu1 %v2760_v48 }
  0x67   :  { %557 = vmatprep.subr.bf16.mxu0 %v2764_v49  ;;  %598 = vmatprep.subr.bf16.mxu1 %v2766_v50 }
  0x6a   :  { %558 = vmatpush1.bf16.msra.mxu0 %v2770_v51  ;;  %599 = vmatpush1.bf16.msra.mxu1 %v2772_v52 }
  0x6b   :  { %559 = vmatprep.subr.bf16.mxu0 %v2776_v53  ;;  %600 = vmatprep.subr.bf16.mxu1 %v2778_v54 }
  0x6e   :  { %560 = vmatpush1.bf16.msra.mxu0 %v2782_v55  ;;  %601 = vmatpush1.bf16.msra.mxu1 %v2784_v56 }
  0x6f   :  { %561 = vmatprep.subr.bf16.mxu0 %v2788_v57  ;;  %602 = vmatprep.subr.bf16.mxu1 %v2790_v58  ;;  %v146_v58 = vld [vmem:[#allocation2] sm:$0xf] }
  0x72   :  { %562 = vmatpush1.bf16.msra.mxu0 %v2794_v59  ;;  %603 = vmatpush1.bf16.msra.mxu1 %v2796_v60 }
  0x73   :  { %563 = vmatprep.subr.bf16.mxu0 %v2800_v61  ;;  %604 = vmatprep.subr.bf16.mxu1 %v2802_v62  ;;  %v3659_v62 = vmov 0  }
  0x76   :  { %564 = vmatpush1.bf16.msra.mxu0 %v2806_v63  ;;  %605 = vmatpush1.bf16.msra.mxu1 %v2808_v0 }
  0x77   :  { %663 = vmatprep.subr.bf16.mxu0 %v2618_v1  ;;  %704 = vmatprep.subr.bf16.mxu1 %v2620_v2 }
  0x79   :  { %582 = vmatmul.mubr.bf16.vlgmr.msra.gmra.mrb[4].mxu0 %v146_v58  ;;  %623 = vmatmul.mubr.bf16.vlgmr.msra.gmra.mrb[4].mxu1 %v146_v58 }
  0x7a   :  { %664 = vmatpush1.bf16.msra.mxu0 %v2623_v3  ;;  %705 = vmatpush1.bf16.msra.mxu1 %v2625_v4 }
  0x7b   :  { %665 = vmatprep.subr.bf16.mxu0 %v2628_v5  ;;  %706 = vmatprep.subr.bf16.mxu1 %v2632_v6 }
  0x7c   :  { %695 = vmatprep.mubr.bf16.mxu0 %v3659_v62  ;;  %736 = vmatprep.mubr.bf16.mxu1 %v3659_v62 }
  0x7e   :  { %666 = vmatpush1.bf16.msra.mxu0 %v2634_v7  ;;  %707 = vmatpush1.bf16.msra.mxu1 %v2637_v8 }
  0x7f   :  { %667 = vmatprep.subr.bf16.mxu0 %v2640_v9  ;;  %708 = vmatprep.subr.bf16.mxu1 %v2642_v10 }
  0x82   :  { %668 = vmatpush1.bf16.msra.mxu0 %v2644_v11  ;;  %709 = vmatpush1.bf16.msra.mxu1 %v2646_v12 }
  0x83   :  { %669 = vmatprep.subr.bf16.mxu0 %v2650_v13  ;;  %710 = vmatprep.subr.bf16.mxu1 %v2654_v14 }
  0x86   :  { %670 = vmatpush1.bf16.msra.mxu0 %v2656_v15  ;;  %711 = vmatpush1.bf16.msra.mxu1 %v2660_v16 }
  0x87   :  { %671 = vmatprep.subr.bf16.mxu0 %v2662_v17  ;;  %712 = vmatprep.subr.bf16.mxu1 %v2666_v18 }
  0x8a   :  { %672 = vmatpush1.bf16.msra.mxu0 %v2668_v19  ;;  %713 = vmatpush1.bf16.msra.mxu1 %v2670_v20 }
  0x8b   :  { %673 = vmatprep.subr.bf16.mxu0 %v2674_v21  ;;  %714 = vmatprep.subr.bf16.mxu1 %v2678_v22  ;;  %v126_v21 = vlaneseq }
  0x8e   :  { %674 = vmatpush1.bf16.msra.mxu0 %v2680_v23  ;;  %715 = vmatpush1.bf16.msra.mxu1 %v2684_v24 }
  0x8f   :  { %675 = vmatprep.subr.bf16.mxu0 %v2686_v25  ;;  %716 = vmatprep.subr.bf16.mxu1 %v2690_v26 }
  0x92   :  { %676 = vmatpush1.bf16.msra.mxu0 %v2692_v27  ;;  %717 = vmatpush1.bf16.msra.mxu1 %v2694_v28 }
  0x93   :  { %677 = vmatprep.subr.bf16.mxu0 %v2698_v29  ;;  %718 = vmatprep.subr.bf16.mxu1 %v2702_v30  ;;  %v127_v29 = vshrl.u32 %v126_v21, 7 }
  0x95   :  { %v128_v20 = vsub.s32 0, %v127_v29 }
  0x96   :  { %678 = vmatpush1.bf16.msra.mxu0 %v2704_v31  ;;  %719 = vmatpush1.bf16.msra.mxu1 %v2708_v32  ;;  %v124_v31 = vld [vmem:[%s3504_s3] sm:$0xf]  ;;  %v132_v32 = vsub.s32 1, %v127_v29  ;;  %s2546_s3 = smov [#allocation8]  }
  0x97   :  { %745 = vmatprep.subr.bf16.mxu0 %v2710_v33  ;;  %786 = vmatprep.subr.bf16.mxu1 %v2714_v34  ;;  %v2853_v30 = vrot.slane %v124_v31, %v128_v20  ;;  %s2044_s26 = sshll.u32 %s2546_s3, 4  ;;  %s2045_s26 = int_to_ptr.vmem [resolvable:$true] %s2044_s26 }
  0x98   :  { %v2855_v19 = vrot.slane %v124_v31, %v132_v32  ;;  %v136_v32 = vsub.s32 2, %v127_v29  ;;  %s2510_s29 = scalar_lea.vmem %s2045_s26, 1024  ;;  %p2515_p11 = scmp.lt.s32.totalorder %s2045_s26, %s2045_s26 }
  0x99   :  { %p2511_p10 = scmp.ne.s32.totalorder %s2045_s26, %s2510_s29  ;;  %p2516_p12 = scmp.lt.s32.totalorder %s2510_s29, %s2510_s29 }
  0x9b   :  { %p2517_p13 = por %p2516_p12, %p2515_p11 }
  0x9d   :  { %p2518_p0 = pnand %p2517_p13, %p2511_p10 }
 0x12c   :  { %v341_v58 = vpop.f32.mrb[0].mxu0  ;;  %v382_v25 = vpop.f32.mrb[0].mxu1 }
 0x12d   :  { %v343_v24 = vpop.f32.mrb[1].mxu0  ;;  %v384_v26 = vpop.f32.mrb[1].mxu1 }
 0x12e   :  { %v345_v23 = vpop.f32.mrb[2].mxu0  ;;  %v386_v27 = vpop.f32.mrb[2].mxu1 }
 0x12f   :  { %v346_v22 = vpop.f32.mrb[3].mxu0  ;;  %v387_v28 = vpop.f32.mrb[3].mxu1 }
 0x130   :  { %v140_v28 = vsub.s32 3, %v127_v29 }
 0x132   :  { %v2859_v9 = vrot.slane %v124_v31, %v140_v28  ;;  %v3660_v28 = vld [vmem:[#allocation40_spill] sm:$0xff] }
 0x14c   :  { %v583_v33 = vpop.f32.mrb[4].mxu0  ;;  %v624_v34 = vpop.f32.mrb[4].mxu1 }
 0x14d   :  { %v584_v18 = vadd.f32 %v583_v33, %v341_v58  ;;  %v625_v17 = vadd.f32 %v624_v34, %v382_v25  ;;  %v585_v23 = vpop.f32.mrb[5].mxu0  ;;  %v626_v27 = vpop.f32.mrb[5].mxu1 }
 0x14e   :  { %v586_v22 = vadd.f32 %v585_v23, %v343_v24  ;;  %v627_v16 = vadd.f32 %v626_v27, %v384_v26  ;;  %v587_v21 = vpop.f32.mrb[6].mxu0  ;;  %v628_v15 = vpop.f32.mrb[6].mxu1  ;;  %v2862_v24 = vrot.slane %v124_v31, %v136_v32  ;;  %v3662_v32 = vld [vmem:[#allocation14_spill] sm:$0xff] }
 0x14f   :  { %v631_v14 = vadd.f32 %v584_v18, %v2853_v30  ;;  %v588_v13 = vpop.f32.mrb[7].mxu0  ;;  %v629_v12 = vpop.f32.mrb[7].mxu1  ;;  %v3661_v21 = vld [vmem:[#allocation41_spill] sm:$0xff] }
 0x150   :  { %v632_v20 = vadd.f32 %v586_v22, %v2855_v19  ;;  %v634_v25 = vadd.f32 %v627_v16, %v2859_v9  ;;  %v633_v15 = vadd.f32 %v625_v17, %v2862_v24 }
 0x151   :  { %v2121_v11 = vmul.f32 -1.442695, %v631_v14 }
 0x152   :  { %v2122_v10 = vmul.f32 -1.442695, %v632_v20  ;;  %v2123_v26 = vmul.f32 -1.442695, %v634_v25  ;;  %v661_v20 = vld [vmem:[#allocation2 + $0x4] sm:$0xf] }
 0x153   :  { %2252 = vpow2.f32 %v2121_v11  ;;  %v3663_v25 = vld [vmem:[#allocation15_spill] sm:$0xff] }
 0x154   :  { %2254 = vpow2.f32 %v2122_v10 }
 0x155   :  { %2256 = vpow2.f32 %v2123_v26  ;;  %v3664_v26 = vld [vmem:[#allocation16_spill] sm:$0xff] }
 0x156   :  { %2258 = vtanh.f32 %v633_v15  ;;  %v3665_v15 = vld [vmem:[#allocation17_spill] sm:$0xff] }
 0x15d   :  { %v2253_v33 = vpop.eup %2252 }
 0x15e   :  { %v2255_v18 = vpop.eup %2254  ;;  %v638_v13 = vadd.f32 1.0, %v2253_v33  ;;  %v3666_v33 = vld [vmem:[#allocation18_spill] sm:$0xff] }
 0x15f   :  { %v644_v12 = vadd.f32 1.0, %v2255_v18  ;;  %v2257_v14 = vpop.eup %2256  ;;  %v3667_v18 = vld [vmem:[#allocation19_spill] sm:$0xff] }
 0x160   :  { %2260 = vrcp.f32 %v638_v13  ;;  %v2259_v34 = vpop.eup %2258  ;;  %v651_v58 = vadd.f32 1.0, %v2257_v14  ;;  %v3668_v13 = vld [vmem:[#allocation20_spill] sm:$0xff]  ;;  %v3670_v14 = vld [vmem:[#allocation22_spill] sm:$0xff] }
 0x161   :  { %2262 = vrcp.f32 %v644_v12  ;;  %v3669_v12 = vld [vmem:[#allocation21_spill] sm:$0xff] }
 0x162   :  { %2264 = vrcp.f32 %v651_v58  ;;  %v3675_v58 = vld [vmem:[#allocation27_spill] sm:$0xff] }
 0x16a   :  { %v2261_v11 = vpop.eup %2260 }
 0x16b   :  { %v2263_v29 = vpop.eup %2262  ;;  %v655_v10 = vmul.f32 %v2261_v11, %v2259_v34  ;;  %v3671_v34 = vld [vmem:[#allocation23_spill] sm:$0xff]  ;;  %v3672_v11 = vld [vmem:[#allocation24_spill] sm:$0xff] }
 0x16c   :  { %v654_v16 = vmul.f32 0.0, %v2263_v29  ;;  %v2265_v17 = vpop.eup %2264  ;;  %v3673_v29 = vld [vmem:[#allocation25_spill] sm:$0xff] }
 0x16e   :  { %v2865_v31 = vadd.f32 %v655_v10, %v654_v16  ;;  %v3674_v10 = vld [vmem:[#allocation26_spill] sm:$0xff]  ;;  %v3676_v16 = vld [vmem:[#allocation28_spill] sm:$0xff] }
 0x170   :  { %2266 = vtanh.f32 %v2865_v31 }
 0x17a   :  { %v2267_v23 = vpop.eup %2266 }
 0x17b   :  { %v658_v27 = vmul.f32 %v2267_v23, %v2265_v17  ;;  %v3677_v17 = vld [vmem:[#allocation29_spill] sm:$0xff]  ;;  %v3678_v23 = vld [vmem:[#allocation30_spill] sm:$0xff] }
 0x17d   :  { %659 = vst [vmem:[#allocation8] sm:$0xff] %v658_v27  ;;  %v662_v22 = vpack.c.bf16 %v658_v27, %v658_v27  ;;  %v3679_v27 = vld [vmem:[#allocation31_spill] sm:$0xff] }
 0x17f   :  { %696 = vmatmul.mubr.bf16.vlgmr.msra.gmra.mrb[8].mxu0 %v662_v22  ;;  %737 = vmatmul.mubr.bf16.vlgmr.msra.gmra.mrb[8].mxu1 %v662_v22  ;;  %v3680_v22 = vld [vmem:[#allocation32_spill] sm:$0xff] }
 0x180   :  { %746 = vmatpush1.bf16.msra.mxu0 %v2716_v35  ;;  %787 = vmatpush1.bf16.msra.mxu1 %v2718_v36 }
 0x181   :  { %747 = vmatprep.subr.bf16.mxu0 %v2722_v37  ;;  %788 = vmatprep.subr.bf16.mxu1 %v2726_v38 }
 0x182   :  { %777 = vmatprep.mubr.bf16.mxu0 %v3659_v62  ;;  %818 = vmatprep.mubr.bf16.mxu1 %v3659_v62 }
 0x184   :  { %748 = vmatpush1.bf16.msra.mxu0 %v2730_v39  ;;  %789 = vmatpush1.bf16.msra.mxu1 %v2734_v40 }
 0x185   :  { %749 = vmatprep.subr.bf16.mxu0 %v2736_v41  ;;  %790 = vmatprep.subr.bf16.mxu1 %v2740_v42 }
 0x188   :  { %750 = vmatpush1.bf16.msra.mxu0 %v2744_v43  ;;  %791 = vmatpush1.bf16.msra.mxu1 %v2746_v44 }
 0x189   :  { %751 = vmatprep.subr.bf16.mxu0 %v2750_v45  ;;  %792 = vmatprep.subr.bf16.mxu1 %v2754_v46 }
 0x18c   :  { %752 = vmatpush1.bf16.msra.mxu0 %v2758_v47  ;;  %793 = vmatpush1.bf16.msra.mxu1 %v2760_v48 }
 0x18d   :  { %753 = vmatprep.subr.bf16.mxu0 %v2764_v49  ;;  %794 = vmatprep.subr.bf16.mxu1 %v2766_v50 }
 0x190   :  { %754 = vmatpush1.bf16.msra.mxu0 %v2770_v51  ;;  %795 = vmatpush1.bf16.msra.mxu1 %v2772_v52 }
 0x191   :  { %755 = vmatprep.subr.bf16.mxu0 %v2776_v53  ;;  %796 = vmatprep.subr.bf16.mxu1 %v2778_v54 }
 0x194   :  { %756 = vmatpush1.bf16.msra.mxu0 %v2782_v55  ;;  %797 = vmatpush1.bf16.msra.mxu1 %v2784_v56 }
 0x195   :  { %757 = vmatprep.subr.bf16.mxu0 %v2788_v57  ;;  %798 = vmatprep.subr.bf16.mxu1 %v3660_v28 }
 0x198   :  { %758 = vmatpush1.bf16.msra.mxu0 %v2794_v59  ;;  %799 = vmatpush1.bf16.msra.mxu1 %v2796_v60 }
 0x199   :  { %759 = vmatprep.subr.bf16.mxu0 %v2800_v61  ;;  %800 = vmatprep.subr.bf16.mxu1 %v3661_v21 }
 0x19c   :  { %760 = vmatpush1.bf16.msra.mxu0 %v2806_v63  ;;  %801 = vmatpush1.bf16.msra.mxu1 %v2808_v0 }
 0x19d   :  { %860 = vmatprep.subr.bf16.mxu0 %v2618_v1  ;;  %901 = vmatprep.subr.bf16.mxu1 %v2620_v2 }
 0x19f   :  { %778 = vmatmul.mubr.bf16.vlgmr.msra.gmra.mrb[12].mxu0 %v661_v20  ;;  %819 = vmatmul.mubr.bf16.vlgmr.msra.gmra.mrb[12].mxu1 %v661_v20  ;;  %v3681_v20 = vld [vmem:[#allocation33_spill] sm:$0xff] }
 0x1a0   :  { %861 = vmatpush1.bf16.msra.mxu0 %v2623_v3  ;;  %902 = vmatpush1.bf16.msra.mxu1 %v2625_v4 }
 0x1a1   :  { %862 = vmatprep.subr.bf16.mxu0 %v2628_v5  ;;  %903 = vmatprep.subr.bf16.mxu1 %v2632_v6 }
 0x1a2   :  { %892 = vmatprep.mubr.bf16.mxu0 %v3659_v62  ;;  %933 = vmatprep.mubr.bf16.mxu1 %v3659_v62 }
 0x1a4   :  { %863 = vmatpush1.bf16.msra.mxu0 %v2634_v7  ;;  %904 = vmatpush1.bf16.msra.mxu1 %v2637_v8 }
 0x1a5   :  { %864 = vmatprep.subr.bf16.mxu0 %v3662_v32  ;;  %905 = vmatprep.subr.bf16.mxu1 %v3663_v25 }
 0x1a8   :  { %865 = vmatpush1.bf16.msra.mxu0 %v3664_v26  ;;  %906 = vmatpush1.bf16.msra.mxu1 %v3665_v15 }
 0x1a9   :  { %866 = vmatprep.subr.bf16.mxu0 %v3666_v33  ;;  %907 = vmatprep.subr.bf16.mxu1 %v3667_v18 }
 0x1ac   :  { %867 = vmatpush1.bf16.msra.mxu0 %v3668_v13  ;;  %908 = vmatpush1.bf16.msra.mxu1 %v3669_v12 }
 0x1ad   :  { %868 = vmatprep.subr.bf16.mxu0 %v3670_v14  ;;  %909 = vmatprep.subr.bf16.mxu1 %v3671_v34  ;;  %v3682_v34 = vld [vmem:[#allocation34_spill] sm:$0xff] }
 0x1b0   :  { %869 = vmatpush1.bf16.msra.mxu0 %v3672_v11  ;;  %910 = vmatpush1.bf16.msra.mxu1 %v3673_v29  ;;  %v3683_v11 = vld [vmem:[#allocation35_spill] sm:$0xff]  ;;  %v3684_v29 = vld [vmem:[#allocation36_spill] sm:$0xff] }
 0x1b1   :  { %870 = vmatprep.subr.bf16.mxu0 %v3674_v10  ;;  %911 = vmatprep.subr.bf16.mxu1 %v3675_v58  ;;  %v3685_v10 = vld [vmem:[#allocation37_spill] sm:$0xff]  ;;  %v3686_v58 = vld [vmem:[#allocation38_spill] sm:$0xff] }
 0x1b4   :  { %871 = vmatpush1.bf16.msra.mxu0 %v3676_v16  ;;  %912 = vmatpush1.bf16.msra.mxu1 %v3677_v17  ;;  %v3687_v16 = vld [vmem:[#allocation39_spill] sm:$0xff] }
 0x1b5   :  { %872 = vmatprep.subr.bf16.mxu0 %v3678_v23  ;;  %913 = vmatprep.subr.bf16.mxu1 %v3679_v27 }
 0x1b8   :  { %873 = vmatpush1.bf16.msra.mxu0 %v3680_v22  ;;  %914 = vmatpush1.bf16.msra.mxu1 %v3681_v20 }
 0x1b9   :  { %874 = vmatprep.subr.bf16.mxu0 %v3682_v34  ;;  %915 = vmatprep.subr.bf16.mxu1 %v3683_v11 }
 0x1bc   :  { %875 = vmatpush1.bf16.msra.mxu0 %v3684_v29  ;;  %916 = vmatpush1.bf16.msra.mxu1 %v3685_v10 }
 0x1bd   :  { %942 = vmatprep.subr.bf16.mxu0 %v3686_v58  ;;  %983 = vmatprep.subr.bf16.mxu1 %v3687_v16 }
 0x252   :  { %v697_v17 = vpop.f32.mrb[8].mxu0  ;;  %v738_v23 = vpop.f32.mrb[8].mxu1 }
 0x253   :  { %v699_v14 = vpop.f32.mrb[9].mxu0  ;;  %v740_v27 = vpop.f32.mrb[9].mxu1 }
 0x254   :  { %v701_v12 = vpop.f32.mrb[10].mxu0  ;;  %v742_v22 = vpop.f32.mrb[10].mxu1 }
 0x255   :  { %v702_v13 = vpop.f32.mrb[11].mxu0  ;;  %v743_v20 = vpop.f32.mrb[11].mxu1 }
 0x256   :  { %v3688_v20 = vld [vmem:[#allocation12_spill] sm:$0xff] }
 0x272   :  { %v779_v18 = vpop.f32.mrb[12].mxu0  ;;  %v820_v34 = vpop.f32.mrb[12].mxu1 }
 0x273   :  { %v780_v33 = vadd.f32 %v779_v18, %v697_v17  ;;  %v821_v11 = vadd.f32 %v820_v34, %v738_v23  ;;  %v781_v15 = vpop.f32.mrb[13].mxu0  ;;  %v822_v29 = vpop.f32.mrb[13].mxu1 }
 0x274   :  { %v782_v26 = vadd.f32 %v781_v15, %v699_v14  ;;  %v823_v10 = vadd.f32 %v822_v29, %v740_v27  ;;  %v783_v25 = vpop.f32.mrb[14].mxu0  ;;  %v824_v58 = vpop.f32.mrb[14].mxu1 }
 0x275   :  { %v827_v16 = vadd.f32 %v780_v33, %v2853_v30  ;;  %v784_v32 = vpop.f32.mrb[15].mxu0  ;;  %v825_v8 = vpop.f32.mrb[15].mxu1  ;;  %v829_v34 = vadd.f32 %v821_v11, %v2862_v24 }
 0x276   :  { %v828_v7 = vadd.f32 %v782_v26, %v2855_v19  ;;  %v830_v13 = vadd.f32 %v823_v10, %v2859_v9 }
 0x277   :  { %v2124_v12 = vmul.f32 -1.442695, %v827_v16 }
 0x278   :  { %v2125_v22 = vmul.f32 -1.442695, %v828_v7  ;;  %v2126_v18 = vmul.f32 -1.442695, %v830_v13  ;;  %v3697_v13 = vld [vmem:[#allocation21_spill] sm:$0xff] }
 0x279   :  { %2268 = vpow2.f32 %v2124_v12  ;;  %v3689_v12 = vld [vmem:[#allocation13_spill] sm:$0xff] }
 0x27a   :  { %2270 = vpow2.f32 %v2125_v22  ;;  %v3692_v22 = vld [vmem:[#allocation16_spill] sm:$0xff] }
 0x27b   :  { %2272 = vpow2.f32 %v2126_v18  ;;  %v3698_v18 = vld [vmem:[#allocation22_spill] sm:$0xff] }
 0x27c   :  { %2274 = vtanh.f32 %v829_v34  ;;  %v3699_v34 = vld [vmem:[#allocation23_spill] sm:$0xff] }
 0x283   :  { %v2269_v17 = vpop.eup %2268 }
 0x284   :  { %v2271_v15 = vpop.eup %2270  ;;  %v834_v14 = vadd.f32 1.0, %v2269_v17  ;;  %v3700_v17 = vld [vmem:[#allocation24_spill] sm:$0xff] }
 0x285   :  { %v840_v25 = vadd.f32 1.0, %v2271_v15  ;;  %v2273_v8 = vpop.eup %2272  ;;  %v3701_v15 = vld [vmem:[#allocation25_spill] sm:$0xff] }
 0x286   :  { %2276 = vrcp.f32 %v834_v14  ;;  %v2275_v32 = vpop.eup %2274  ;;  %v847_v29 = vadd.f32 1.0, %v2273_v8  ;;  %v3702_v14 = vld [vmem:[#allocation26_spill] sm:$0xff]  ;;  %v3704_v8 = vld [vmem:[#allocation28_spill] sm:$0xff] }
 0x287   :  { %2278 = vrcp.f32 %v840_v25  ;;  %v3703_v25 = vld [vmem:[#allocation27_spill] sm:$0xff] }
 0x288   :  { %2280 = vrcp.f32 %v847_v29  ;;  %v3709_v29 = vld [vmem:[#allocation33_spill] sm:$0xff] }
 0x290   :  { %v2277_v26 = vpop.eup %2276 }
 0x291   :  { %v2279_v33 = vpop.eup %2278  ;;  %v851_v7 = vmul.f32 %v2277_v26, %v2275_v32  ;;  %v3705_v32 = vld [vmem:[#allocation29_spill] sm:$0xff]  ;;  %v3706_v26 = vld [vmem:[#allocation30_spill] sm:$0xff] }
 0x292   :  { %v850_v58 = vmul.f32 %v2279_v33, %v2865_v31  ;;  %v2281_v11 = vpop.eup %2280  ;;  %v858_v31 = vld [vmem:[#allocation2 + $0x8] sm:$0xf]  ;;  %v3707_v33 = vld [vmem:[#allocation31_spill] sm:$0xff] }
 0x294   :  { %v2941_v10 = vadd.f32 %v851_v7, %v850_v58  ;;  %v3708_v7 = vld [vmem:[#allocation32_spill] sm:$0xff]  ;;  %v3710_v58 = vld [vmem:[#allocation34_spill] sm:$0xff] }
 0x296   :  { %2282 = vtanh.f32 %v2941_v10 }
 0x2a0   :  { %v2283_v16 = vpop.eup %2282 }
 0x2a1   :  { %v854_v23 = vmul.f32 %v2283_v16, %v2281_v11  ;;  %v3711_v11 = vld [vmem:[#allocation35_spill] sm:$0xff]  ;;  %v3712_v16 = vld [vmem:[#allocation36_spill] sm:$0xff] }
 0x2a3   :  { %856 = vst [vmem:[#allocation8 + $0x8] sm:$0xff] %v854_v23  ;;  %v859_v27 = vpack.c.bf16 %v854_v23, %v854_v23  ;;  %v3713_v23 = vld [vmem:[#allocation37_spill] sm:$0xff] }
 0x2a5   :  { %893 = vmatmul.mubr.bf16.vlgmr.msra.gmra.mrb[16].mxu0 %v859_v27  ;;  %934 = vmatmul.mubr.bf16.vlgmr.msra.gmra.mrb[16].mxu1 %v859_v27  ;;  %v3714_v27 = vld [vmem:[#allocation38_spill] sm:$0xff] }
 0x2a6   :  { %943 = vmatpush1.bf16.msra.mxu0 %v2716_v35  ;;  %984 = vmatpush1.bf16.msra.mxu1 %v2718_v36 }
 0x2a7   :  { %944 = vmatprep.subr.bf16.mxu0 %v2722_v37  ;;  %985 = vmatprep.subr.bf16.mxu1 %v2726_v38 }
 0x2a8   :  { %974 = vmatprep.mubr.bf16.mxu0 %v3659_v62  ;;  %1015 = vmatprep.mubr.bf16.mxu1 %v3659_v62 }
 0x2aa   :  { %945 = vmatpush1.bf16.msra.mxu0 %v2730_v39  ;;  %986 = vmatpush1.bf16.msra.mxu1 %v2734_v40 }
 0x2ab   :  { %946 = vmatprep.subr.bf16.mxu0 %v2736_v41  ;;  %987 = vmatprep.subr.bf16.mxu1 %v2740_v42 }
 0x2ae   :  { %947 = vmatpush1.bf16.msra.mxu0 %v2744_v43  ;;  %988 = vmatpush1.bf16.msra.mxu1 %v2746_v44 }
 0x2af   :  { %948 = vmatprep.subr.bf16.mxu0 %v2750_v45  ;;  %989 = vmatprep.subr.bf16.mxu1 %v2754_v46 }
 0x2b2   :  { %949 = vmatpush1.bf16.msra.mxu0 %v2758_v47  ;;  %990 = vmatpush1.bf16.msra.mxu1 %v2760_v48 }
 0x2b3   :  { %950 = vmatprep.subr.bf16.mxu0 %v2764_v49  ;;  %991 = vmatprep.subr.bf16.mxu1 %v2766_v50 }
 0x2b6   :  { %951 = vmatpush1.bf16.msra.mxu0 %v2770_v51  ;;  %992 = vmatpush1.bf16.msra.mxu1 %v2772_v52 }
 0x2b7   :  { %952 = vmatprep.subr.bf16.mxu0 %v2776_v53  ;;  %993 = vmatprep.subr.bf16.mxu1 %v2778_v54 }
 0x2ba   :  { %953 = vmatpush1.bf16.msra.mxu0 %v2782_v55  ;;  %994 = vmatpush1.bf16.msra.mxu1 %v2784_v56 }
 0x2bb   :  { %954 = vmatprep.subr.bf16.mxu0 %v2788_v57  ;;  %995 = vmatprep.subr.bf16.mxu1 %v3660_v28 }
 0x2be   :  { %955 = vmatpush1.bf16.msra.mxu0 %v2794_v59  ;;  %996 = vmatpush1.bf16.msra.mxu1 %v2796_v60 }
 0x2bf   :  { %956 = vmatprep.subr.bf16.mxu0 %v2800_v61  ;;  %997 = vmatprep.subr.bf16.mxu1 %v3661_v21 }
 0x2c2   :  { %957 = vmatpush1.bf16.msra.mxu0 %v2806_v63  ;;  %998 = vmatpush1.bf16.msra.mxu1 %v2808_v0 }
 0x2c3   :  { %1057 = vmatprep.subr.bf16.mxu0 %v2618_v1  ;;  %1098 = vmatprep.subr.bf16.mxu1 %v2620_v2  ;;  %v3690_v1 = vld [vmem:[#allocation14_spill] sm:$0xff]  ;;  %v3691_v2 = vld [vmem:[#allocation15_spill] sm:$0xff] }
 0x2c5   :  { %975 = vmatmul.mubr.bf16.vlgmr.msra.gmra.mrb[20].mxu0 %v858_v31  ;;  %1016 = vmatmul.mubr.bf16.vlgmr.msra.gmra.mrb[20].mxu1 %v858_v31  ;;  %v3715_v31 = vld [vmem:[#allocation39_spill] sm:$0xff] }
 0x2c6   :  { %1058 = vmatpush1.bf16.msra.mxu0 %v2623_v3  ;;  %1099 = vmatpush1.bf16.msra.mxu1 %v2625_v4  ;;  %v3693_v3 = vld [vmem:[#allocation17_spill] sm:$0xff]  ;;  %v3694_v4 = vld [vmem:[#allocation18_spill] sm:$0xff] }
 0x2c7   :  { %1059 = vmatprep.subr.bf16.mxu0 %v2628_v5  ;;  %1100 = vmatprep.subr.bf16.mxu1 %v2632_v6  ;;  %v3695_v5 = vld [vmem:[#allocation19_spill] sm:$0xff]  ;;  %v3696_v6 = vld [vmem:[#allocation20_spill] sm:$0xff] }
 0x2c8   :  { %1089 = vmatprep.mubr.bf16.mxu0 %v3659_v62  ;;  %1130 = vmatprep.mubr.bf16.mxu1 %v3659_v62 }
 0x2ca   :  { %1060 = vmatpush1.bf16.msra.mxu0 %v3688_v20  ;;  %1101 = vmatpush1.bf16.msra.mxu1 %v3689_v12 }
 0x2cb   :  { %1061 = vmatprep.subr.bf16.mxu0 %v3690_v1  ;;  %1102 = vmatprep.subr.bf16.mxu1 %v3691_v2 }
 0x2ce   :  { %1062 = vmatpush1.bf16.msra.mxu0 %v3692_v22  ;;  %1103 = vmatpush1.bf16.msra.mxu1 %v3693_v3 }
 0x2cf   :  { %1063 = vmatprep.subr.bf16.mxu0 %v3694_v4  ;;  %1104 = vmatprep.subr.bf16.mxu1 %v3695_v5 }
 0x2d2   :  { %1064 = vmatpush1.bf16.msra.mxu0 %v3696_v6  ;;  %1105 = vmatpush1.bf16.msra.mxu1 %v3697_v13 }
 0x2d3   :  { %1065 = vmatprep.subr.bf16.mxu0 %v3698_v18  ;;  %1106 = vmatprep.subr.bf16.mxu1 %v3699_v34 }
 0x2d6   :  { %1066 = vmatpush1.bf16.msra.mxu0 %v3700_v17  ;;  %1107 = vmatpush1.bf16.msra.mxu1 %v3701_v15 }
 0x2d7   :  { %1067 = vmatprep.subr.bf16.mxu0 %v3702_v14  ;;  %1108 = vmatprep.subr.bf16.mxu1 %v3703_v25 }
 0x2da   :  { %1068 = vmatpush1.bf16.msra.mxu0 %v3704_v8  ;;  %1109 = vmatpush1.bf16.msra.mxu1 %v3705_v32 }
 0x2db   :  { %1069 = vmatprep.subr.bf16.mxu0 %v3706_v26  ;;  %1110 = vmatprep.subr.bf16.mxu1 %v3707_v33 }
 0x2de   :  { %1070 = vmatpush1.bf16.msra.mxu0 %v3708_v7  ;;  %1111 = vmatpush1.bf16.msra.mxu1 %v3709_v29 }
 0x2df   :  { %1071 = vmatprep.subr.bf16.mxu0 %v3710_v58  ;;  %1112 = vmatprep.subr.bf16.mxu1 %v3711_v11 }
 0x2e2   :  { %1072 = vmatpush1.bf16.msra.mxu0 %v3712_v16  ;;  %1113 = vmatpush1.bf16.msra.mxu1 %v3713_v23 }
 0x2e3   :  { %1139 = vmatprep.subr.bf16.mxu0 %v3714_v27  ;;  %1180 = vmatprep.subr.bf16.mxu1 %v3715_v31 }
 0x378   :  { %v894_v20 = vpop.f32.mrb[16].mxu0  ;;  %v935_v12 = vpop.f32.mrb[16].mxu1 }
 0x379   :  { %v896_v1 = vpop.f32.mrb[17].mxu0  ;;  %v937_v2 = vpop.f32.mrb[17].mxu1 }
 0x37a   :  { %v898_v22 = vpop.f32.mrb[18].mxu0  ;;  %v939_v3 = vpop.f32.mrb[18].mxu1 }
 0x37b   :  { %v899_v4 = vpop.f32.mrb[19].mxu0  ;;  %v940_v5 = vpop.f32.mrb[19].mxu1 }
 0x398   :  { %v976_v6 = vpop.f32.mrb[20].mxu0  ;;  %v1017_v13 = vpop.f32.mrb[20].mxu1 }
 0x399   :  { %v977_v18 = vadd.f32 %v976_v6, %v894_v20  ;;  %v1018_v34 = vadd.f32 %v1017_v13, %v935_v12  ;;  %v978_v17 = vpop.f32.mrb[21].mxu0  ;;  %v1019_v15 = vpop.f32.mrb[21].mxu1 }
 0x39a   :  { %v979_v14 = vadd.f32 %v978_v17, %v896_v1  ;;  %v1020_v25 = vadd.f32 %v1019_v15, %v937_v2  ;;  %v980_v8 = vpop.f32.mrb[22].mxu0  ;;  %v1021_v32 = vpop.f32.mrb[22].mxu1 }
 0x39b   :  { %v1024_v26 = vadd.f32 %v977_v18, %v2853_v30  ;;  %v981_v33 = vpop.f32.mrb[23].mxu0  ;;  %v1022_v7 = vpop.f32.mrb[23].mxu1  ;;  %v1026_v27 = vadd.f32 %v1018_v34, %v2862_v24  ;;  %v3147_v8 = vld [vmem:[#allocation7 + $0xe8] ss:$16 sps:$4 sm:$0xff]   ;;  %v3150_v32 = vld [vmem:[#allocation5 + $0x4] ss:$16 sps:$4 sm:$0xff]  }
 0x39c   :  { %v1025_v29 = vadd.f32 %v979_v14, %v2855_v19  ;;  %v1027_v16 = vadd.f32 %v1020_v25, %v2859_v9  ;;  %v3144_v25 = vld [vmem:[#allocation7 + $0xe0] ss:$16 sps:$4 sm:$0xff]   ;;  %3741 = vst [vmem:[#allocation35_spill] sm:$0xff] %v3147_v8  ;;  %3742 = vst [vmem:[#allocation36_spill] sm:$0xff] %v3150_v32 }
 0x39d   :  { %v2127_v58 = vmul.f32 -1.442695, %v1024_v26  ;;  %3740 = vst [vmem:[#allocation34_spill] sm:$0xff] %v3144_v25  ;;  %v3153_v26 = vld [vmem:[#allocation5 + $0xc] ss:$16 sps:$4 sm:$0xff]  }
 0x39e   :  { %v2128_v11 = vmul.f32 -1.442695, %v1025_v29  ;;  %v2129_v23 = vmul.f32 -1.442695, %v1027_v16  ;;  %3743 = vst [vmem:[#allocation37_spill] sm:$0xff] %v3153_v26 }
 0x39f   :  { %2284 = vpow2.f32 %v2127_v58 }
 0x3a0   :  { %2286 = vpow2.f32 %v2128_v11 }
 0x3a1   :  { %2288 = vpow2.f32 %v2129_v23 }
 0x3a2   :  { %2290 = vtanh.f32 %v1026_v27 }
 0x3a9   :  { %v2285_v31 = vpop.eup %2284 }
 0x3aa   :  { %v2287_v20 = vpop.eup %2286  ;;  %v1031_v12 = vadd.f32 1.0, %v2285_v31 }
 0x3ab   :  { %v1037_v1 = vadd.f32 1.0, %v2287_v20  ;;  %v2289_v2 = vpop.eup %2288 }
 0x3ac   :  { %2292 = vrcp.f32 %v1031_v12  ;;  %v2291_v22 = vpop.eup %2290  ;;  %v1044_v6 = vadd.f32 1.0, %v2289_v2 }
 0x3ad   :  { %2294 = vrcp.f32 %v1037_v1 }
 0x3ae   :  { %2296 = vrcp.f32 %v1044_v6 }
 0x3b6   :  { %v2293_v3 = vpop.eup %2292 }
 0x3b7   :  { %v2295_v4 = vpop.eup %2294  ;;  %v1048_v5 = vmul.f32 %v2293_v3, %v2291_v22 }
 0x3b8   :  { %v1047_v13 = vmul.f32 %v2295_v4, %v2941_v10  ;;  %v2297_v34 = vpop.eup %2296  ;;  %v3141_v10 = vld [vmem:[#allocation7 + $0xec] ss:$16 sps:$4 sm:$0xff]  }
 0x3b9   :  { %3739 = vst [vmem:[#allocation33_spill] sm:$0xff] %v3141_v10 }
 0x3ba   :  { %v3017_v18 = vadd.f32 %v1048_v5, %v1047_v13 }
 0x3bc   :  { %2298 = vtanh.f32 %v3017_v18 }
 0x3c6   :  { %v2299_v17 = vpop.eup %2298 }
 0x3c7   :  { %v1051_v15 = vmul.f32 %v2299_v17, %v2297_v34 }
 0x3c9   :  { %1053 = vst [vmem:[#allocation8 + $0x10] sm:$0xff] %v1051_v15  ;;  %v1056_v14 = vpack.c.bf16 %v1051_v15, %v1051_v15 }
 0x3cb   :  { %1090 = vmatmul.mubr.bf16.vlgmr.msra.gmra.mrb[24].mxu0 %v1056_v14  ;;  %1131 = vmatmul.mubr.bf16.vlgmr.msra.gmra.mrb[24].mxu1 %v1056_v14 }
 0x3cc   :  { %1140 = vmatpush1.bf16.msra.mxu0 %v2716_v35  ;;  %1181 = vmatpush1.bf16.msra.mxu1 %v2718_v36  ;;  %v1055_v35 = vld [vmem:[#allocation2 + $0xc] sm:$0xf]  ;;  %v3052_v36 = vld [vmem:[#allocation7 + $0x4] ss:$16 sps:$4 sm:$0xff]  }
 0x3cd   :  { %1141 = vmatprep.subr.bf16.mxu0 %v2722_v37  ;;  %1182 = vmatprep.subr.bf16.mxu1 %v2726_v38  ;;  %v3055_v37 = vld [vmem:[#allocation7 + $0xc] ss:$16 sps:$4 sm:$0xff]   ;;  %v3058_v38 = vld [vmem:[#allocation7] ss:$16 sps:$4 sm:$0xff]  }
 0x3ce   :  { %1171 = vmatprep.mubr.bf16.mxu0 %v3659_v62  ;;  %1212 = vmatprep.mubr.bf16.mxu1 %v3659_v62 }
 0x3d0   :  { %1142 = vmatpush1.bf16.msra.mxu0 %v2730_v39  ;;  %1183 = vmatpush1.bf16.msra.mxu1 %v2734_v40  ;;  %v3061_v39 = vld [vmem:[#allocation7 + $0x8] ss:$16 sps:$4 sm:$0xff]   ;;  %v3067_v40 = vld [vmem:[#allocation7 + $0x2c] ss:$16 sps:$4 sm:$0xff]  }
 0x3d1   :  { %1143 = vmatprep.subr.bf16.mxu0 %v2736_v41  ;;  %1184 = vmatprep.subr.bf16.mxu1 %v2740_v42  ;;  %v3072_v41 = vld [vmem:[#allocation7 + $0x20] ss:$16 sps:$4 sm:$0xff]   ;;  %v3075_v42 = vld [vmem:[#allocation7 + $0x28] ss:$16 sps:$4 sm:$0xff]  }
 0x3d2   :  { %3716 = vst [vmem:[#allocation40_spill] sm:$0xff] %v3072_v41  ;;  %3717 = vst [vmem:[#allocation41_spill] sm:$0xff] %v3075_v42 }
 0x3d4   :  { %1144 = vmatpush1.bf16.msra.mxu0 %v2744_v43  ;;  %1185 = vmatpush1.bf16.msra.mxu1 %v2746_v44  ;;  %v3078_v43 = vld [vmem:[#allocation7 + $0x44] ss:$16 sps:$4 sm:$0xff]   ;;  %v3081_v44 = vld [vmem:[#allocation7 + $0x4c] ss:$16 sps:$4 sm:$0xff]  }
 0x3d5   :  { %1145 = vmatprep.subr.bf16.mxu0 %v2750_v45  ;;  %1186 = vmatprep.subr.bf16.mxu1 %v2754_v46  ;;  %3718 = vst [vmem:[#allocation12_spill] sm:$0xff] %v3078_v43  ;;  %3719 = vst [vmem:[#allocation13_spill] sm:$0xff] %v3081_v44  ;;  %v3084_v45 = vld [vmem:[#allocation7 + $0x40] ss:$16 sps:$4 sm:$0xff]   ;;  %v3087_v46 = vld [vmem:[#allocation7 + $0x48] ss:$16 sps:$4 sm:$0xff]  }
 0x3d6   :  { %3720 = vst [vmem:[#allocation14_spill] sm:$0xff] %v3084_v45  ;;  %3721 = vst [vmem:[#allocation15_spill] sm:$0xff] %v3087_v46 }
 0x3d8   :  { %1146 = vmatpush1.bf16.msra.mxu0 %v2758_v47  ;;  %1187 = vmatpush1.bf16.msra.mxu1 %v2760_v48  ;;  %v3090_v47 = vld [vmem:[#allocation7 + $0x64] ss:$16 sps:$4 sm:$0xff]   ;;  %v3093_v48 = vld [vmem:[#allocation7 + $0x6c] ss:$16 sps:$4 sm:$0xff]  }
 0x3d9   :  { %1147 = vmatprep.subr.bf16.mxu0 %v2764_v49  ;;  %1188 = vmatprep.subr.bf16.mxu1 %v2766_v50  ;;  %3722 = vst [vmem:[#allocation16_spill] sm:$0xff] %v3090_v47  ;;  %3723 = vst [vmem:[#allocation17_spill] sm:$0xff] %v3093_v48  ;;  %v3096_v49 = vld [vmem:[#allocation7 + $0x60] ss:$16 sps:$4 sm:$0xff]   ;;  %v3099_v50 = vld [vmem:[#allocation7 + $0x68] ss:$16 sps:$4 sm:$0xff]  }
 0x3da   :  { %3724 = vst [vmem:[#allocation18_spill] sm:$0xff] %v3096_v49  ;;  %3725 = vst [vmem:[#allocation19_spill] sm:$0xff] %v3099_v50 }
 0x3dc   :  { %1148 = vmatpush1.bf16.msra.mxu0 %v2770_v51  ;;  %1189 = vmatpush1.bf16.msra.mxu1 %v2772_v52  ;;  %v3102_v51 = vld [vmem:[#allocation7 + $0x84] ss:$16 sps:$4 sm:$0xff]   ;;  %v3105_v52 = vld [vmem:[#allocation7 + $0x8c] ss:$16 sps:$4 sm:$0xff]  }
 0x3dd   :  { %1149 = vmatprep.subr.bf16.mxu0 %v2776_v53  ;;  %1190 = vmatprep.subr.bf16.mxu1 %v2778_v54  ;;  %3726 = vst [vmem:[#allocation20_spill] sm:$0xff] %v3102_v51  ;;  %3727 = vst [vmem:[#allocation21_spill] sm:$0xff] %v3105_v52  ;;  %v3108_v53 = vld [vmem:[#allocation7 + $0x80] ss:$16 sps:$4 sm:$0xff]   ;;  %v3111_v54 = vld [vmem:[#allocation7 + $0x88] ss:$16 sps:$4 sm:$0xff]  }
 0x3de   :  { %3728 = vst [vmem:[#allocation22_spill] sm:$0xff] %v3108_v53  ;;  %3729 = vst [vmem:[#allocation23_spill] sm:$0xff] %v3111_v54 }
 0x3e0   :  { %1150 = vmatpush1.bf16.msra.mxu0 %v2782_v55  ;;  %1191 = vmatpush1.bf16.msra.mxu1 %v2784_v56  ;;  %v3114_v55 = vld [vmem:[#allocation7 + $0xa4] ss:$16 sps:$4 sm:$0xff]   ;;  %v3117_v56 = vld [vmem:[#allocation7 + $0xac] ss:$16 sps:$4 sm:$0xff]  }
 0x3e1   :  { %1151 = vmatprep.subr.bf16.mxu0 %v2788_v57  ;;  %1192 = vmatprep.subr.bf16.mxu1 %v3660_v28  ;;  %3730 = vst [vmem:[#allocation24_spill] sm:$0xff] %v3114_v55  ;;  %3731 = vst [vmem:[#allocation25_spill] sm:$0xff] %v3117_v56  ;;  %v3120_v57 = vld [vmem:[#allocation7 + $0xa0] ss:$16 sps:$4 sm:$0xff]   ;;  %v3135_v28 = vld [vmem:[#allocation7 + $0xc8] ss:$16 sps:$4 sm:$0xff]  }
 0x3e2   :  { %3732 = vst [vmem:[#allocation26_spill] sm:$0xff] %v3120_v57  ;;  %3737 = vst [vmem:[#allocation31_spill] sm:$0xff] %v3135_v28 }
 0x3e4   :  { %1152 = vmatpush1.bf16.msra.mxu0 %v2794_v59  ;;  %1193 = vmatpush1.bf16.msra.mxu1 %v2796_v60  ;;  %v3123_v59 = vld [vmem:[#allocation7 + $0xa8] ss:$16 sps:$4 sm:$0xff]   ;;  %v3126_v60 = vld [vmem:[#allocation7 + $0xc4] ss:$16 sps:$4 sm:$0xff]  }
 0x3e5   :  { %1153 = vmatprep.subr.bf16.mxu0 %v2800_v61  ;;  %1194 = vmatprep.subr.bf16.mxu1 %v3661_v21  ;;  %3733 = vst [vmem:[#allocation27_spill] sm:$0xff] %v3123_v59  ;;  %3734 = vst [vmem:[#allocation28_spill] sm:$0xff] %v3126_v60  ;;  %v3129_v61 = vld [vmem:[#allocation7 + $0xcc] ss:$16 sps:$4 sm:$0xff]   ;;  %v3138_v21 = vld [vmem:[#allocation7 + $0xe4] ss:$16 sps:$4 sm:$0xff]  }
 0x3e6   :  { %3735 = vst [vmem:[#allocation29_spill] sm:$0xff] %v3129_v61  ;;  %3738 = vst [vmem:[#allocation32_spill] sm:$0xff] %v3138_v21 }
 0x3e8   :  { %1154 = vmatpush1.bf16.msra.mxu0 %v2806_v63  ;;  %1195 = vmatpush1.bf16.msra.mxu1 %v2808_v0  ;;  %v3064_v0 = vld [vmem:[#allocation7 + $0x24] ss:$16 sps:$4 sm:$0xff]   ;;  %v3132_v63 = vld [vmem:[#allocation7 + $0xc0] ss:$16 sps:$4 sm:$0xff]  }
 0x3e9   :  { %1254 = vmatprep.subr.bf16.mxu0 %v3052_v36  ;;  %1295 = vmatprep.subr.bf16.mxu1 %v3055_v37  ;;  %3736 = vst [vmem:[#allocation30_spill] sm:$0xff] %v3132_v63 }
 0x3eb   :  { %1172 = vmatmul.mubr.bf16.vlgmr.msra.gmra.mrb[28].mxu0 %v1055_v35  ;;  %1213 = vmatmul.mubr.bf16.vlgmr.msra.gmra.mrb[28].mxu1 %v1055_v35 }
 0x3ec   :  { %1255 = vmatpush1.bf16.msra.mxu0 %v3058_v38  ;;  %1296 = vmatpush1.bf16.msra.mxu1 %v3061_v39 }
 0x3ed   :  { %1256 = vmatprep.subr.bf16.mxu0 %v3064_v0  ;;  %1297 = vmatprep.subr.bf16.mxu1 %v3067_v40 }
 0x3ee   :  { %1286 = vmatprep.mubr.bf16.mxu0 %v3659_v62  ;;  %1327 = vmatprep.mubr.bf16.mxu1 %v3659_v62 }
 0x3f0   :  { %1257 = vmatpush1.bf16.msra.mxu0 %v3072_v41  ;;  %1298 = vmatpush1.bf16.msra.mxu1 %v3075_v42 }
 0x3f1   :  { %1258 = vmatprep.subr.bf16.mxu0 %v3078_v43  ;;  %1299 = vmatprep.subr.bf16.mxu1 %v3081_v44 }
 0x3f4   :  { %1259 = vmatpush1.bf16.msra.mxu0 %v3084_v45  ;;  %1300 = vmatpush1.bf16.msra.mxu1 %v3087_v46 }
 0x3f5   :  { %1260 = vmatprep.subr.bf16.mxu0 %v3090_v47  ;;  %1301 = vmatprep.subr.bf16.mxu1 %v3093_v48 }
 0x3f8   :  { %1261 = vmatpush1.bf16.msra.mxu0 %v3096_v49  ;;  %1302 = vmatpush1.bf16.msra.mxu1 %v3099_v50 }
 0x3f9   :  { %1262 = vmatprep.subr.bf16.mxu0 %v3102_v51  ;;  %1303 = vmatprep.subr.bf16.mxu1 %v3105_v52 }
 0x3fc   :  { %1263 = vmatpush1.bf16.msra.mxu0 %v3108_v53  ;;  %1304 = vmatpush1.bf16.msra.mxu1 %v3111_v54 }
 0x3fd   :  { %1264 = vmatprep.subr.bf16.mxu0 %v3114_v55  ;;  %1305 = vmatprep.subr.bf16.mxu1 %v3117_v56 }
 0x400   :  { %1265 = vmatpush1.bf16.msra.mxu0 %v3120_v57  ;;  %1306 = vmatpush1.bf16.msra.mxu1 %v3123_v59 }
 0x401   :  { %1266 = vmatprep.subr.bf16.mxu0 %v3126_v60  ;;  %1307 = vmatprep.subr.bf16.mxu1 %v3129_v61 }
 0x404   :  { %1267 = vmatpush1.bf16.msra.mxu0 %v3132_v63  ;;  %1308 = vmatpush1.bf16.msra.mxu1 %v3135_v28 }
 0x405   :  { %1268 = vmatprep.subr.bf16.mxu0 %v3138_v21  ;;  %1309 = vmatprep.subr.bf16.mxu1 %v3141_v10 }
 0x408   :  { %1269 = vmatpush1.bf16.msra.mxu0 %v3144_v25  ;;  %1310 = vmatpush1.bf16.msra.mxu1 %v3147_v8 }
 0x409   :  { %1336 = vmatprep.subr.bf16.mxu0 %v3150_v32  ;;  %1377 = vmatprep.subr.bf16.mxu1 %v3153_v26 }
 0x49e   :  { %v1091_v33 = vpop.f32.mrb[24].mxu0  ;;  %v1132_v7 = vpop.f32.mrb[24].mxu1 }
 0x49f   :  { %v1093_v29 = vpop.f32.mrb[25].mxu0  ;;  %v1134_v58 = vpop.f32.mrb[25].mxu1 }
 0x4a0   :  { %v1095_v11 = vpop.f32.mrb[26].mxu0  ;;  %v1136_v16 = vpop.f32.mrb[26].mxu1 }
 0x4a1   :  { %v1096_v23 = vpop.f32.mrb[27].mxu0  ;;  %v1137_v27 = vpop.f32.mrb[27].mxu1 }
 0x4be   :  { %v1173_v31 = vpop.f32.mrb[28].mxu0  ;;  %v1214_v20 = vpop.f32.mrb[28].mxu1 }
 0x4bf   :  { %v1174_v12 = vadd.f32 %v1173_v31, %v1091_v33  ;;  %v1215_v1 = vadd.f32 %v1214_v20, %v1132_v7  ;;  %v1175_v2 = vpop.f32.mrb[29].mxu0  ;;  %v1216_v22 = vpop.f32.mrb[29].mxu1 }
 0x4c0   :  { %v1176_v3 = vadd.f32 %v1175_v2, %v1093_v29  ;;  %v1217_v4 = vadd.f32 %v1216_v22, %v1134_v58  ;;  %v1177_v5 = vpop.f32.mrb[30].mxu0  ;;  %v1218_v6 = vpop.f32.mrb[30].mxu1 }
 0x4c1   :  { %v1221_v13 = vadd.f32 %v1174_v12, %v2853_v30  ;;  %v1178_v34 = vpop.f32.mrb[31].mxu0  ;;  %v1219_v17 = vpop.f32.mrb[31].mxu1  ;;  %v1223_v7 = vadd.f32 %v1215_v1, %v2862_v24 }
 0x4c2   :  { %v1222_v15 = vadd.f32 %v1176_v3, %v2855_v19  ;;  %v1224_v11 = vadd.f32 %v1217_v4, %v2859_v9  ;;  %v3164_v34 = vld [vmem:[#allocation5] ss:$16 sps:$4 sm:$0xff]   ;;  %v3167_v17 = vld [vmem:[#allocation5 + $0x8] ss:$16 sps:$4 sm:$0xff]  }
 0x4c3   :  { %v2130_v14 = vmul.f32 -1.442695, %v1221_v13 }
 0x4c4   :  { %v2131_v35 = vmul.f32 -1.442695, %v1222_v15  ;;  %v2132_v33 = vmul.f32 -1.442695, %v1224_v11  ;;  %v3173_v15 = vld [vmem:[#allocation5 + $0x2c] ss:$16 sps:$4 sm:$0xff]  }
 0x4c5   :  { %2300 = vpow2.f32 %v2130_v14  ;;  %v3178_v14 = vld [vmem:[#allocation5 + $0x20] ss:$16 sps:$4 sm:$0xff]   ;;  %v3184_v11 = vld [vmem:[#allocation5 + $0x44] ss:$16 sps:$4 sm:$0xff]  }
 0x4c6   :  { %2302 = vpow2.f32 %v2131_v35  ;;  %v3181_v35 = vld [vmem:[#allocation5 + $0x28] ss:$16 sps:$4 sm:$0xff]  }
 0x4c7   :  { %2304 = vpow2.f32 %v2132_v33  ;;  %v3187_v33 = vld [vmem:[#allocation5 + $0x4c] ss:$16 sps:$4 sm:$0xff]  }
 0x4c8   :  { %2306 = vtanh.f32 %v1223_v7  ;;  %v3190_v7 = vld [vmem:[#allocation5 + $0x40] ss:$16 sps:$4 sm:$0xff]  }
 0x4cf   :  { %v2301_v16 = vpop.eup %2300 }
 0x4d0   :  { %v2303_v29 = vpop.eup %2302  ;;  %v1228_v58 = vadd.f32 1.0, %v2301_v16  ;;  %v3193_v16 = vld [vmem:[#allocation5 + $0x48] ss:$16 sps:$4 sm:$0xff]  }
 0x4d1   :  { %v1234_v23 = vadd.f32 1.0, %v2303_v29  ;;  %v2305_v27 = vpop.eup %2304  ;;  %v3196_v29 = vld [vmem:[#allocation5 + $0x64] ss:$16 sps:$4 sm:$0xff]  }
 0x4d2   :  { %2308 = vrcp.f32 %v1228_v58  ;;  %v2307_v31 = vpop.eup %2306  ;;  %v1241_v22 = vadd.f32 1.0, %v2305_v27  ;;  %v3199_v58 = vld [vmem:[#allocation5 + $0x6c] ss:$16 sps:$4 sm:$0xff]   ;;  %v3205_v27 = vld [vmem:[#allocation5 + $0x68] ss:$16 sps:$4 sm:$0xff]  }
 0x4d3   :  { %2310 = vrcp.f32 %v1234_v23  ;;  %v3202_v23 = vld [vmem:[#allocation5 + $0x60] ss:$16 sps:$4 sm:$0xff]  }
 0x4d4   :  { %2312 = vrcp.f32 %v1241_v22  ;;  %v3220_v22 = vld [vmem:[#allocation5 + $0xa4] ss:$16 sps:$4 sm:$0xff]  }
 0x4d5   :  { %3744 = vst [vmem:[#allocation38_spill] sm:$0xff] %v3220_v22 }
 0x4dc   :  { %v2309_v20 = vpop.eup %2308 }
 0x4dd   :  { %v2311_v12 = vpop.eup %2310  ;;  %v1245_v2 = vmul.f32 %v2309_v20, %v2307_v31  ;;  %v3208_v31 = vld [vmem:[#allocation5 + $0x84] ss:$16 sps:$4 sm:$0xff]   ;;  %v3211_v20 = vld [vmem:[#allocation5 + $0x8c] ss:$16 sps:$4 sm:$0xff]  }
 0x4de   :  { %v1244_v3 = vmul.f32 %v2311_v12, %v3017_v18  ;;  %v2313_v1 = vpop.eup %2312  ;;  %v3170_v18 = vld [vmem:[#allocation5 + $0x24] ss:$16 sps:$4 sm:$0xff]   ;;  %v3214_v12 = vld [vmem:[#allocation5 + $0x80] ss:$16 sps:$4 sm:$0xff]  }
 0x4e0   :  { %v3161_v4 = vadd.f32 %v1245_v2, %v1244_v3  ;;  %v3217_v2 = vld [vmem:[#allocation5 + $0x88] ss:$16 sps:$4 sm:$0xff]   ;;  %v3223_v3 = vld [vmem:[#allocation5 + $0xac] ss:$16 sps:$4 sm:$0xff]  }
 0x4e1   :  { %3745 = vst [vmem:[#allocation39_spill] sm:$0xff] %v3223_v3 }
 0x4e2   :  { %2314 = vtanh.f32 %v3161_v4 }
 0x4ec   :  { %v2315_v5 = vpop.eup %2314 }
 0x4ed   :  { %v1248_v6 = vmul.f32 %v2315_v5, %v2313_v1  ;;  %v3226_v1 = vld [vmem:[#allocation5 + $0xa0] ss:$16 sps:$4 sm:$0xff]   ;;  %v3229_v5 = vld [vmem:[#allocation5 + $0xa8] ss:$16 sps:$4 sm:$0xff]  }
 0x4ee   :  { %3746 = vst [vmem:[#allocation42_spill] sm:$0xff] %v3226_v1  ;;  %3747 = vst [vmem:[#allocation43_spill] sm:$0xff] %v3229_v5 }
 0x4ef   :  { %1250 = vst [vmem:[#allocation8 + $0x18] sm:$0xff] %v1248_v6  ;;  %v1253_v13 = vpack.c.bf16 %v1248_v6, %v1248_v6  ;;  %v3232_v6 = vld [vmem:[#allocation5 + $0xc4] ss:$16 sps:$4 sm:$0xff]  }
 0x4f0   :  { %3748 = vst [vmem:[#allocation44_spill] sm:$0xff] %v3232_v6 }
 0x4f1   :  { %1287 = vmatmul.mubr.bf16.vlgmr.msra.gmra.mrb[32].mxu0 %v1253_v13  ;;  %1328 = vmatmul.mubr.bf16.vlgmr.msra.gmra.mrb[32].mxu1 %v1253_v13  ;;  %v3235_v13 = vld [vmem:[#allocation5 + $0xcc] ss:$16 sps:$4 sm:$0xff]  }
 0x4f2   :  { %1337 = vmatpush1.bf16.msra.mxu0 %v3164_v34  ;;  %1378 = vmatpush1.bf16.msra.mxu1 %v3167_v17  ;;  %3749 = vst [vmem:[#allocation45_spill] sm:$0xff] %v3235_v13 }
 0x4f3   :  { %1338 = vmatprep.subr.bf16.mxu0 %v3170_v18  ;;  %1379 = vmatprep.subr.bf16.mxu1 %v3173_v15 }
 0x4f4   :  { %1368 = vmatprep.mubr.bf16.mxu0 %v3659_v62  ;;  %1409 = vmatprep.mubr.bf16.mxu1 %v3659_v62 }
 0x4f6   :  { %1339 = vmatpush1.bf16.msra.mxu0 %v3178_v14  ;;  %1380 = vmatpush1.bf16.msra.mxu1 %v3181_v35 }
 0x4f7   :  { %1340 = vmatprep.subr.bf16.mxu0 %v3184_v11  ;;  %1381 = vmatprep.subr.bf16.mxu1 %v3187_v33 }
 0x4fa   :  { %1341 = vmatpush1.bf16.msra.mxu0 %v3190_v7  ;;  %1382 = vmatpush1.bf16.msra.mxu1 %v3193_v16 }
 0x4fb   :  { %1342 = vmatprep.subr.bf16.mxu0 %v3196_v29  ;;  %1383 = vmatprep.subr.bf16.mxu1 %v3199_v58 }
 0x4fe   :  { %1343 = vmatpush1.bf16.msra.mxu0 %v3202_v23  ;;  %1384 = vmatpush1.bf16.msra.mxu1 %v3205_v27 }
 0x4ff   :  { %1344 = vmatprep.subr.bf16.mxu0 %v3208_v31  ;;  %1385 = vmatprep.subr.bf16.mxu1 %v3211_v20 }
 0x502   :  { %1345 = vmatpush1.bf16.msra.mxu0 %v3214_v12  ;;  %1386 = vmatpush1.bf16.msra.mxu1 %v3217_v2 }
 0x503   :  { %1346 = vmatprep.subr.bf16.mxu0 %v3220_v22  ;;  %1387 = vmatprep.subr.bf16.mxu1 %v3223_v3  ;;  %v3238_v22 = vld [vmem:[#allocation5 + $0xc0] ss:$16 sps:$4 sm:$0xff]   ;;  %v3241_v3 = vld [vmem:[#allocation5 + $0xc8] ss:$16 sps:$4 sm:$0xff]  }
 0x504   :  { %3750 = vst [vmem:[#allocation46_spill] sm:$0xff] %v3238_v22 }
 0x506   :  { %1347 = vmatpush1.bf16.msra.mxu0 %v3226_v1  ;;  %1388 = vmatpush1.bf16.msra.mxu1 %v3229_v5  ;;  %v3244_v1 = vld [vmem:[#allocation5 + $0xe4] ss:$16 sps:$4 sm:$0xff]   ;;  %v3247_v5 = vld [vmem:[#allocation5 + $0xec] ss:$16 sps:$4 sm:$0xff]  }
 0x507   :  { %1348 = vmatprep.subr.bf16.mxu0 %v3232_v6  ;;  %1389 = vmatprep.subr.bf16.mxu1 %v3235_v13  ;;  %v3250_v6 = vld [vmem:[#allocation5 + $0xe0] ss:$16 sps:$4 sm:$0xff]   ;;  %v3253_v13 = vld [vmem:[#allocation5 + $0xe8] ss:$16 sps:$4 sm:$0xff]  }
 0x50a   :  { %1349 = vmatpush1.bf16.msra.mxu0 %v3238_v22  ;;  %1390 = vmatpush1.bf16.msra.mxu1 %v3241_v3  ;;  %v1252_v22 = vld [vmem:[#allocation2 + $0x10] sm:$0xf] }
 0x50b   :  { %1350 = vmatprep.subr.bf16.mxu0 %v3244_v1  ;;  %1391 = vmatprep.subr.bf16.mxu1 %v3247_v5 }
 0x50e   :  { %1351 = vmatpush1.bf16.msra.mxu0 %v3250_v6  ;;  %1392 = vmatpush1.bf16.msra.mxu1 %v3253_v13 }
 0x50f   :  { %1451 = vmatprep.subr.bf16.mxu0 %v3052_v36  ;;  %1492 = vmatprep.subr.bf16.mxu1 %v3055_v37 }
 0x511   :  { %1369 = vmatmul.mubr.bf16.vlgmr.msra.gmra.mrb[36].mxu0 %v1252_v22  ;;  %1410 = vmatmul.mubr.bf16.vlgmr.msra.gmra.mrb[36].mxu1 %v1252_v22 }
 0x512   :  { %1452 = vmatpush1.bf16.msra.mxu0 %v3058_v38  ;;  %1493 = vmatpush1.bf16.msra.mxu1 %v3061_v39 }
 0x513   :  { %1453 = vmatprep.subr.bf16.mxu0 %v3064_v0  ;;  %1494 = vmatprep.subr.bf16.mxu1 %v3067_v40 }
 0x514   :  { %1483 = vmatprep.mubr.bf16.mxu0 %v3659_v62  ;;  %1524 = vmatprep.mubr.bf16.mxu1 %v3659_v62 }
 0x516   :  { %1454 = vmatpush1.bf16.msra.mxu0 %v3072_v41  ;;  %1495 = vmatpush1.bf16.msra.mxu1 %v3075_v42 }
 0x517   :  { %1455 = vmatprep.subr.bf16.mxu0 %v3078_v43  ;;  %1496 = vmatprep.subr.bf16.mxu1 %v3081_v44 }
 0x51a   :  { %1456 = vmatpush1.bf16.msra.mxu0 %v3084_v45  ;;  %1497 = vmatpush1.bf16.msra.mxu1 %v3087_v46 }
 0x51b   :  { %1457 = vmatprep.subr.bf16.mxu0 %v3090_v47  ;;  %1498 = vmatprep.subr.bf16.mxu1 %v3093_v48 }
 0x51e   :  { %1458 = vmatpush1.bf16.msra.mxu0 %v3096_v49  ;;  %1499 = vmatpush1.bf16.msra.mxu1 %v3099_v50 }
 0x51f   :  { %1459 = vmatprep.subr.bf16.mxu0 %v3102_v51  ;;  %1500 = vmatprep.subr.bf16.mxu1 %v3105_v52 }
 0x522   :  { %1460 = vmatpush1.bf16.msra.mxu0 %v3108_v53  ;;  %1501 = vmatpush1.bf16.msra.mxu1 %v3111_v54 }
 0x523   :  { %1461 = vmatprep.subr.bf16.mxu0 %v3114_v55  ;;  %1502 = vmatprep.subr.bf16.mxu1 %v3117_v56 }
 0x526   :  { %1462 = vmatpush1.bf16.msra.mxu0 %v3120_v57  ;;  %1503 = vmatpush1.bf16.msra.mxu1 %v3123_v59 }
 0x527   :  { %1463 = vmatprep.subr.bf16.mxu0 %v3126_v60  ;;  %1504 = vmatprep.subr.bf16.mxu1 %v3129_v61 }
 0x52a   :  { %1464 = vmatpush1.bf16.msra.mxu0 %v3132_v63  ;;  %1505 = vmatpush1.bf16.msra.mxu1 %v3135_v28 }
 0x52b   :  { %1465 = vmatprep.subr.bf16.mxu0 %v3138_v21  ;;  %1506 = vmatprep.subr.bf16.mxu1 %v3141_v10 }
 0x52e   :  { %1466 = vmatpush1.bf16.msra.mxu0 %v3144_v25  ;;  %1507 = vmatpush1.bf16.msra.mxu1 %v3147_v8 }
 0x52f   :  { %1533 = vmatprep.subr.bf16.mxu0 %v3150_v32  ;;  %1574 = vmatprep.subr.bf16.mxu1 %v3153_v26 }
 0x5c4   :  { %v1288_v22 = vpop.f32.mrb[32].mxu0  ;;  %v1329_v60 = vpop.f32.mrb[32].mxu1 }
 0x5c5   :  { %v1290_v59 = vpop.f32.mrb[33].mxu0  ;;  %v1331_v61 = vpop.f32.mrb[33].mxu1 }
 0x5c6   :  { %v1292_v57 = vpop.f32.mrb[34].mxu0  ;;  %v1333_v63 = vpop.f32.mrb[34].mxu1 }
 0x5c7   :  { %v1293_v56 = vpop.f32.mrb[35].mxu0  ;;  %v1334_v28 = vpop.f32.mrb[35].mxu1 }
 0x5e4   :  { %v1370_v55 = vpop.f32.mrb[36].mxu0  ;;  %v1411_v21 = vpop.f32.mrb[36].mxu1 }
 0x5e5   :  { %v1371_v54 = vadd.f32 %v1370_v55, %v1288_v22  ;;  %v1412_v10 = vadd.f32 %v1411_v21, %v1329_v60  ;;  %v1372_v53 = vpop.f32.mrb[37].mxu0  ;;  %v1413_v25 = vpop.f32.mrb[37].mxu1  ;;  %v3752_v22 = vld [vmem:[#allocation39_spill] sm:$0xff] }
 0x5e6   :  { %v1373_v52 = vadd.f32 %v1372_v53, %v1290_v59  ;;  %v1414_v8 = vadd.f32 %v1413_v25, %v1331_v61  ;;  %v1374_v51 = vpop.f32.mrb[38].mxu0  ;;  %v1415_v32 = vpop.f32.mrb[38].mxu1 }
 0x5e7   :  { %v1418_v26 = vadd.f32 %v1371_v54, %v2853_v30  ;;  %v1375_v50 = vpop.f32.mrb[39].mxu0  ;;  %v1416_v49 = vpop.f32.mrb[39].mxu1  ;;  %v1420_v60 = vadd.f32 %v1412_v10, %v2862_v24 }
 0x5e8   :  { %v1419_v48 = vadd.f32 %v1373_v52, %v2855_v19  ;;  %v1421_v56 = vadd.f32 %v1414_v8, %v2859_v9 }
 0x5e9   :  { %v2133_v57 = vmul.f32 -1.442695, %v1418_v26 }
 0x5ea   :  { %v2134_v63 = vmul.f32 -1.442695, %v1419_v48  ;;  %v2135_v55 = vmul.f32 -1.442695, %v1421_v56  ;;  %v3755_v56 = vld [vmem:[#allocation44_spill] sm:$0xff] }
 0x5eb   :  { %2316 = vpow2.f32 %v2133_v57  ;;  %v3753_v57 = vld [vmem:[#allocation42_spill] sm:$0xff] }
 0x5ec   :  { %2318 = vpow2.f32 %v2134_v63  ;;  %v3754_v63 = vld [vmem:[#allocation43_spill] sm:$0xff] }
 0x5ed   :  { %2320 = vpow2.f32 %v2135_v55  ;;  %v3756_v55 = vld [vmem:[#allocation45_spill] sm:$0xff] }
 0x5ee   :  { %2322 = vtanh.f32 %v1420_v60  ;;  %v3757_v60 = vld [vmem:[#allocation46_spill] sm:$0xff] }
 0x5f5   :  { %v2317_v28 = vpop.eup %2316 }
 0x5f6   :  { %v2319_v53 = vpop.eup %2318  ;;  %v1425_v59 = vadd.f32 1.0, %v2317_v28  ;;  %v1449_v28 = vld [vmem:[#allocation2 + $0x14] sm:$0xf] }
 0x5f7   :  { %v1431_v51 = vadd.f32 1.0, %v2319_v53  ;;  %v2321_v49 = vpop.eup %2320  ;;  %v3758_v53 = vld [vmem:[#allocation17_spill] sm:$0xff] }
 0x5f8   :  { %2324 = vrcp.f32 %v1425_v59  ;;  %v2323_v50 = vpop.eup %2322  ;;  %v1438_v61 = vadd.f32 1.0, %v2321_v49  ;;  %v3759_v59 = vld [vmem:[#allocation18_spill] sm:$0xff]  ;;  %v3761_v49 = vld [vmem:[#allocation20_spill] sm:$0xff] }
 0x5f9   :  { %2326 = vrcp.f32 %v1431_v51  ;;  %v3760_v51 = vld [vmem:[#allocation19_spill] sm:$0xff] }
 0x5fa   :  { %2328 = vrcp.f32 %v1438_v61  ;;  %v3766_v61 = vld [vmem:[#allocation25_spill] sm:$0xff] }
 0x602   :  { %v2325_v52 = vpop.eup %2324 }
 0x603   :  { %v2327_v54 = vpop.eup %2326  ;;  %v1442_v48 = vmul.f32 %v2325_v52, %v2323_v50  ;;  %v3762_v50 = vld [vmem:[#allocation21_spill] sm:$0xff]  ;;  %v3763_v52 = vld [vmem:[#allocation22_spill] sm:$0xff] }
 0x604   :  { %v1441_v21 = vmul.f32 %v2327_v54, %v3161_v4  ;;  %v2329_v10 = vpop.eup %2328  ;;  %v3751_v4 = vld [vmem:[#allocation38_spill] sm:$0xff]  ;;  %v3764_v54 = vld [vmem:[#allocation23_spill] sm:$0xff] }
 0x606   :  { %v3297_v25 = vadd.f32 %v1442_v48, %v1441_v21  ;;  %v3765_v48 = vld [vmem:[#allocation24_spill] sm:$0xff]  ;;  %v3767_v21 = vld [vmem:[#allocation26_spill] sm:$0xff] }
 0x608   :  { %2330 = vtanh.f32 %v3297_v25 }
 0x612   :  { %v2331_v8 = vpop.eup %2330 }
 0x613   :  { %v1445_v32 = vmul.f32 %v2331_v8, %v2329_v10  ;;  %v3768_v10 = vld [vmem:[#allocation27_spill] sm:$0xff]  ;;  %v3769_v8 = vld [vmem:[#allocation28_spill] sm:$0xff] }
 0x615   :  { %1447 = vst [vmem:[#allocation8 + $0x20] sm:$0xff] %v1445_v32  ;;  %v1450_v26 = vpack.c.bf16 %v1445_v32, %v1445_v32  ;;  %v3770_v32 = vld [vmem:[#allocation29_spill] sm:$0xff] }
 0x617   :  { %1484 = vmatmul.mubr.bf16.vlgmr.msra.gmra.mrb[40].mxu0 %v1450_v26  ;;  %1525 = vmatmul.mubr.bf16.vlgmr.msra.gmra.mrb[40].mxu1 %v1450_v26  ;;  %v3771_v26 = vld [vmem:[#allocation30_spill] sm:$0xff] }
 0x618   :  { %1534 = vmatpush1.bf16.msra.mxu0 %v3164_v34  ;;  %1575 = vmatpush1.bf16.msra.mxu1 %v3167_v17 }
 0x619   :  { %1535 = vmatprep.subr.bf16.mxu0 %v3170_v18  ;;  %1576 = vmatprep.subr.bf16.mxu1 %v3173_v15 }
 0x61a   :  { %1565 = vmatprep.mubr.bf16.mxu0 %v3659_v62  ;;  %1606 = vmatprep.mubr.bf16.mxu1 %v3659_v62 }
 0x61c   :  { %1536 = vmatpush1.bf16.msra.mxu0 %v3178_v14  ;;  %1577 = vmatpush1.bf16.msra.mxu1 %v3181_v35 }
 0x61d   :  { %1537 = vmatprep.subr.bf16.mxu0 %v3184_v11  ;;  %1578 = vmatprep.subr.bf16.mxu1 %v3187_v33 }
 0x620   :  { %1538 = vmatpush1.bf16.msra.mxu0 %v3190_v7  ;;  %1579 = vmatpush1.bf16.msra.mxu1 %v3193_v16 }
 0x621   :  { %1539 = vmatprep.subr.bf16.mxu0 %v3196_v29  ;;  %1580 = vmatprep.subr.bf16.mxu1 %v3199_v58 }
 0x624   :  { %1540 = vmatpush1.bf16.msra.mxu0 %v3202_v23  ;;  %1581 = vmatpush1.bf16.msra.mxu1 %v3205_v27 }
 0x625   :  { %1541 = vmatprep.subr.bf16.mxu0 %v3208_v31  ;;  %1582 = vmatprep.subr.bf16.mxu1 %v3211_v20 }
 0x628   :  { %1542 = vmatpush1.bf16.msra.mxu0 %v3214_v12  ;;  %1583 = vmatpush1.bf16.msra.mxu1 %v3217_v2 }
 0x629   :  { %1543 = vmatprep.subr.bf16.mxu0 %v3751_v4  ;;  %1584 = vmatprep.subr.bf16.mxu1 %v3752_v22 }
 0x62c   :  { %1544 = vmatpush1.bf16.msra.mxu0 %v3753_v57  ;;  %1585 = vmatpush1.bf16.msra.mxu1 %v3754_v63 }
 0x62d   :  { %1545 = vmatprep.subr.bf16.mxu0 %v3755_v56  ;;  %1586 = vmatprep.subr.bf16.mxu1 %v3756_v55 }
 0x630   :  { %1546 = vmatpush1.bf16.msra.mxu0 %v3757_v60  ;;  %1587 = vmatpush1.bf16.msra.mxu1 %v3241_v3 }
 0x631   :  { %1547 = vmatprep.subr.bf16.mxu0 %v3244_v1  ;;  %1588 = vmatprep.subr.bf16.mxu1 %v3247_v5 }
 0x634   :  { %1548 = vmatpush1.bf16.msra.mxu0 %v3250_v6  ;;  %1589 = vmatpush1.bf16.msra.mxu1 %v3253_v13 }
 0x635   :  { %1648 = vmatprep.subr.bf16.mxu0 %v3052_v36  ;;  %1689 = vmatprep.subr.bf16.mxu1 %v3055_v37 }
 0x637   :  { %1566 = vmatmul.mubr.bf16.vlgmr.msra.gmra.mrb[44].mxu0 %v1449_v28  ;;  %1607 = vmatmul.mubr.bf16.vlgmr.msra.gmra.mrb[44].mxu1 %v1449_v28  ;;  %v3772_v28 = vld [vmem:[#allocation31_spill] sm:$0xff] }
 0x638   :  { %1649 = vmatpush1.bf16.msra.mxu0 %v3058_v38  ;;  %1690 = vmatpush1.bf16.msra.mxu1 %v3061_v39 }
 0x639   :  { %1650 = vmatprep.subr.bf16.mxu0 %v3064_v0  ;;  %1691 = vmatprep.subr.bf16.mxu1 %v3067_v40 }
 0x63a   :  { %1680 = vmatprep.mubr.bf16.mxu0 %v3659_v62  ;;  %1721 = vmatprep.mubr.bf16.mxu1 %v3659_v62 }
 0x63c   :  { %1651 = vmatpush1.bf16.msra.mxu0 %v3072_v41  ;;  %1692 = vmatpush1.bf16.msra.mxu1 %v3075_v42 }
 0x63d   :  { %1652 = vmatprep.subr.bf16.mxu0 %v3078_v43  ;;  %1693 = vmatprep.subr.bf16.mxu1 %v3081_v44 }
 0x640   :  { %1653 = vmatpush1.bf16.msra.mxu0 %v3084_v45  ;;  %1694 = vmatpush1.bf16.msra.mxu1 %v3087_v46 }
 0x641   :  { %1654 = vmatprep.subr.bf16.mxu0 %v3090_v47  ;;  %1695 = vmatprep.subr.bf16.mxu1 %v3758_v53 }
 0x644   :  { %1655 = vmatpush1.bf16.msra.mxu0 %v3759_v59  ;;  %1696 = vmatpush1.bf16.msra.mxu1 %v3760_v51 }
 0x645   :  { %1656 = vmatprep.subr.bf16.mxu0 %v3761_v49  ;;  %1697 = vmatprep.subr.bf16.mxu1 %v3762_v50  ;;  %v3773_v50 = vld [vmem:[#allocation32_spill] sm:$0xff] }
 0x648   :  { %1657 = vmatpush1.bf16.msra.mxu0 %v3763_v52  ;;  %1698 = vmatpush1.bf16.msra.mxu1 %v3764_v54  ;;  %v3774_v52 = vld [vmem:[#allocation33_spill] sm:$0xff]  ;;  %v3775_v54 = vld [vmem:[#allocation34_spill] sm:$0xff] }
 0x649   :  { %1658 = vmatprep.subr.bf16.mxu0 %v3765_v48  ;;  %1699 = vmatprep.subr.bf16.mxu1 %v3766_v61  ;;  %v3776_v48 = vld [vmem:[#allocation35_spill] sm:$0xff]  ;;  %v3777_v61 = vld [vmem:[#allocation36_spill] sm:$0xff] }
 0x64c   :  { %1659 = vmatpush1.bf16.msra.mxu0 %v3767_v21  ;;  %1700 = vmatpush1.bf16.msra.mxu1 %v3768_v10  ;;  %v3778_v21 = vld [vmem:[#allocation37_spill] sm:$0xff] }
 0x64d   :  { %1660 = vmatprep.subr.bf16.mxu0 %v3769_v8  ;;  %1701 = vmatprep.subr.bf16.mxu1 %v3770_v32 }
 0x650   :  { %1661 = vmatpush1.bf16.msra.mxu0 %v3771_v26  ;;  %1702 = vmatpush1.bf16.msra.mxu1 %v3772_v28 }
 0x651   :  { %1662 = vmatprep.subr.bf16.mxu0 %v3773_v50  ;;  %1703 = vmatprep.subr.bf16.mxu1 %v3774_v52 }
 0x654   :  { %1663 = vmatpush1.bf16.msra.mxu0 %v3775_v54  ;;  %1704 = vmatpush1.bf16.msra.mxu1 %v3776_v48 }
 0x655   :  { %1730 = vmatprep.subr.bf16.mxu0 %v3777_v61  ;;  %1771 = vmatprep.subr.bf16.mxu1 %v3778_v21 }
 0x6ea   :  { %v1485_v10 = vpop.f32.mrb[40].mxu0  ;;  %v1526_v8 = vpop.f32.mrb[40].mxu1 }
 0x6eb   :  { %v1487_v49 = vpop.f32.mrb[41].mxu0  ;;  %v1528_v32 = vpop.f32.mrb[41].mxu1 }
 0x6ec   :  { %v1489_v51 = vpop.f32.mrb[42].mxu0  ;;  %v1530_v26 = vpop.f32.mrb[42].mxu1 }
 0x6ed   :  { %v1490_v59 = vpop.f32.mrb[43].mxu0  ;;  %v1531_v28 = vpop.f32.mrb[43].mxu1 }
 0x6ee   :  { %v3779_v28 = vld [vmem:[#allocation40_spill] sm:$0xff] }
 0x70a   :  { %v1567_v53 = vpop.f32.mrb[44].mxu0  ;;  %v1608_v50 = vpop.f32.mrb[44].mxu1 }
 0x70b   :  { %v1568_v47 = vadd.f32 %v1567_v53, %v1485_v10  ;;  %v1609_v52 = vadd.f32 %v1608_v50, %v1526_v8  ;;  %v1569_v46 = vpop.f32.mrb[45].mxu0  ;;  %v1610_v54 = vpop.f32.mrb[45].mxu1 }
 0x70c   :  { %v1570_v45 = vadd.f32 %v1569_v46, %v1487_v49  ;;  %v1611_v48 = vadd.f32 %v1610_v54, %v1528_v32  ;;  %v1571_v44 = vpop.f32.mrb[46].mxu0  ;;  %v1612_v61 = vpop.f32.mrb[46].mxu1 }
 0x70d   :  { %v1615_v21 = vadd.f32 %v1568_v47, %v2853_v30  ;;  %v1572_v43 = vpop.f32.mrb[47].mxu0  ;;  %v1613_v42 = vpop.f32.mrb[47].mxu1  ;;  %v1617_v50 = vadd.f32 %v1609_v52, %v2862_v24 }
 0x70e   :  { %v1616_v41 = vadd.f32 %v1570_v45, %v2855_v19  ;;  %v1618_v59 = vadd.f32 %v1611_v48, %v2859_v9 }
 0x70f   :  { %v2136_v51 = vmul.f32 -1.442695, %v1615_v21 }
 0x710   :  { %v2137_v26 = vmul.f32 -1.442695, %v1616_v41  ;;  %v2138_v53 = vmul.f32 -1.442695, %v1618_v59  ;;  %v3788_v59 = vld [vmem:[#allocation19_spill] sm:$0xff] }
 0x711   :  { %2332 = vpow2.f32 %v2136_v51  ;;  %v3780_v51 = vld [vmem:[#allocation41_spill] sm:$0xff] }
 0x712   :  { %2334 = vpow2.f32 %v2137_v26  ;;  %v3783_v26 = vld [vmem:[#allocation14_spill] sm:$0xff] }
 0x713   :  { %2336 = vpow2.f32 %v2138_v53  ;;  %v3789_v53 = vld [vmem:[#allocation20_spill] sm:$0xff] }
 0x714   :  { %2338 = vtanh.f32 %v1617_v50  ;;  %v3790_v50 = vld [vmem:[#allocation21_spill] sm:$0xff] }
 0x71b   :  { %v2333_v10 = vpop.eup %2332 }
 0x71c   :  { %v2335_v46 = vpop.eup %2334  ;;  %v1622_v49 = vadd.f32 1.0, %v2333_v10  ;;  %v3791_v10 = vld [vmem:[#allocation22_spill] sm:$0xff] }
 0x71d   :  { %v1628_v44 = vadd.f32 1.0, %v2335_v46  ;;  %v2337_v42 = vpop.eup %2336  ;;  %v3792_v46 = vld [vmem:[#allocation23_spill] sm:$0xff] }
 0x71e   :  { %2340 = vrcp.f32 %v1622_v49  ;;  %v2339_v43 = vpop.eup %2338  ;;  %v1635_v54 = vadd.f32 1.0, %v2337_v42  ;;  %v3793_v49 = vld [vmem:[#allocation24_spill] sm:$0xff]  ;;  %v3795_v42 = vld [vmem:[#allocation26_spill] sm:$0xff] }
 0x71f   :  { %2342 = vrcp.f32 %v1628_v44  ;;  %v3794_v44 = vld [vmem:[#allocation25_spill] sm:$0xff] }
 0x720   :  { %2344 = vrcp.f32 %v1635_v54  ;;  %v3800_v54 = vld [vmem:[#allocation31_spill] sm:$0xff] }
 0x728   :  { %v2341_v45 = vpop.eup %2340 }
 0x729   :  { %v2343_v47 = vpop.eup %2342  ;;  %v1639_v41 = vmul.f32 %v2341_v45, %v2339_v43  ;;  %v3796_v43 = vld [vmem:[#allocation27_spill] sm:$0xff]  ;;  %v3797_v45 = vld [vmem:[#allocation28_spill] sm:$0xff] }
 0x72a   :  { %v1638_v61 = vmul.f32 %v2343_v47, %v3297_v25  ;;  %v2345_v52 = vpop.eup %2344  ;;  %v1646_v25 = vld [vmem:[#allocation2 + $0x18] sm:$0xf]  ;;  %v3798_v47 = vld [vmem:[#allocation29_spill] sm:$0xff] }
 0x72c   :  { %v3373_v48 = vadd.f32 %v1639_v41, %v1638_v61  ;;  %v3799_v41 = vld [vmem:[#allocation30_spill] sm:$0xff]  ;;  %v3801_v61 = vld [vmem:[#allocation32_spill] sm:$0xff] }
 0x72e   :  { %2346 = vtanh.f32 %v3373_v48 }
 0x738   :  { %v2347_v21 = vpop.eup %2346 }
 0x739   :  { %v1642_v8 = vmul.f32 %v2347_v21, %v2345_v52  ;;  %v3802_v52 = vld [vmem:[#allocation33_spill] sm:$0xff]  ;;  %v3803_v21 = vld [vmem:[#allocation34_spill] sm:$0xff] }
 0x73b   :  { %1644 = vst [vmem:[#allocation8 + $0x28] sm:$0xff] %v1642_v8  ;;  %v1647_v32 = vpack.c.bf16 %v1642_v8, %v1642_v8  ;;  %v3804_v8 = vld [vmem:[#allocation35_spill] sm:$0xff] }
 0x73d   :  { %1681 = vmatmul.mubr.bf16.vlgmr.msra.gmra.mrb[48].mxu0 %v1647_v32  ;;  %1722 = vmatmul.mubr.bf16.vlgmr.msra.gmra.mrb[48].mxu1 %v1647_v32  ;;  %v3805_v32 = vld [vmem:[#allocation36_spill] sm:$0xff] }
 0x73e   :  { %1731 = vmatpush1.bf16.msra.mxu0 %v3164_v34  ;;  %1772 = vmatpush1.bf16.msra.mxu1 %v3167_v17 }
 0x73f   :  { %1732 = vmatprep.subr.bf16.mxu0 %v3170_v18  ;;  %1773 = vmatprep.subr.bf16.mxu1 %v3173_v15 }
 0x740   :  { %1762 = vmatprep.mubr.bf16.mxu0 %v3659_v62  ;;  %1803 = vmatprep.mubr.bf16.mxu1 %v3659_v62 }
 0x742   :  { %1733 = vmatpush1.bf16.msra.mxu0 %v3178_v14  ;;  %1774 = vmatpush1.bf16.msra.mxu1 %v3181_v35 }
 0x743   :  { %1734 = vmatprep.subr.bf16.mxu0 %v3184_v11  ;;  %1775 = vmatprep.subr.bf16.mxu1 %v3187_v33 }
 0x746   :  { %1735 = vmatpush1.bf16.msra.mxu0 %v3190_v7  ;;  %1776 = vmatpush1.bf16.msra.mxu1 %v3193_v16 }
 0x747   :  { %1736 = vmatprep.subr.bf16.mxu0 %v3196_v29  ;;  %1777 = vmatprep.subr.bf16.mxu1 %v3199_v58 }
 0x74a   :  { %1737 = vmatpush1.bf16.msra.mxu0 %v3202_v23  ;;  %1778 = vmatpush1.bf16.msra.mxu1 %v3205_v27 }
 0x74b   :  { %1738 = vmatprep.subr.bf16.mxu0 %v3208_v31  ;;  %1779 = vmatprep.subr.bf16.mxu1 %v3211_v20 }
 0x74e   :  { %1739 = vmatpush1.bf16.msra.mxu0 %v3214_v12  ;;  %1780 = vmatpush1.bf16.msra.mxu1 %v3217_v2 }
 0x74f   :  { %1740 = vmatprep.subr.bf16.mxu0 %v3751_v4  ;;  %1781 = vmatprep.subr.bf16.mxu1 %v3752_v22 }
 0x752   :  { %1741 = vmatpush1.bf16.msra.mxu0 %v3753_v57  ;;  %1782 = vmatpush1.bf16.msra.mxu1 %v3754_v63 }
 0x753   :  { %1742 = vmatprep.subr.bf16.mxu0 %v3755_v56  ;;  %1783 = vmatprep.subr.bf16.mxu1 %v3756_v55 }
 0x756   :  { %1743 = vmatpush1.bf16.msra.mxu0 %v3757_v60  ;;  %1784 = vmatpush1.bf16.msra.mxu1 %v3241_v3 }
 0x757   :  { %1744 = vmatprep.subr.bf16.mxu0 %v3244_v1  ;;  %1785 = vmatprep.subr.bf16.mxu1 %v3247_v5 }
 0x75a   :  { %1745 = vmatpush1.bf16.msra.mxu0 %v3250_v6  ;;  %1786 = vmatpush1.bf16.msra.mxu1 %v3253_v13 }
 0x75b   :  { %1845 = vmatprep.subr.bf16.mxu0 %v3052_v36  ;;  %1886 = vmatprep.subr.bf16.mxu1 %v3055_v37  ;;  %v3781_v36 = vld [vmem:[#allocation12_spill] sm:$0xff]  ;;  %v3782_v37 = vld [vmem:[#allocation13_spill] sm:$0xff] }
 0x75d   :  { %1763 = vmatmul.mubr.bf16.vlgmr.msra.gmra.mrb[52].mxu0 %v1646_v25  ;;  %1804 = vmatmul.mubr.bf16.vlgmr.msra.gmra.mrb[52].mxu1 %v1646_v25  ;;  %v3806_v25 = vld [vmem:[#allocation37_spill] sm:$0xff] }
 0x75e   :  { %1846 = vmatpush1.bf16.msra.mxu0 %v3058_v38  ;;  %1887 = vmatpush1.bf16.msra.mxu1 %v3061_v39  ;;  %v3784_v38 = vld [vmem:[#allocation15_spill] sm:$0xff]  ;;  %v3785_v39 = vld [vmem:[#allocation16_spill] sm:$0xff] }
 0x75f   :  { %1847 = vmatprep.subr.bf16.mxu0 %v3064_v0  ;;  %1888 = vmatprep.subr.bf16.mxu1 %v3067_v40  ;;  %v3786_v0 = vld [vmem:[#allocation17_spill] sm:$0xff]  ;;  %v3787_v40 = vld [vmem:[#allocation18_spill] sm:$0xff] }
 0x760   :  { %1877 = vmatprep.mubr.bf16.mxu0 %v3659_v62  ;;  %1918 = vmatprep.mubr.bf16.mxu1 %v3659_v62 }
 0x762   :  { %1848 = vmatpush1.bf16.msra.mxu0 %v3779_v28  ;;  %1889 = vmatpush1.bf16.msra.mxu1 %v3780_v51 }
 0x763   :  { %1849 = vmatprep.subr.bf16.mxu0 %v3781_v36  ;;  %1890 = vmatprep.subr.bf16.mxu1 %v3782_v37 }
 0x766   :  { %1850 = vmatpush1.bf16.msra.mxu0 %v3783_v26  ;;  %1891 = vmatpush1.bf16.msra.mxu1 %v3784_v38 }
 0x767   :  { %1851 = vmatprep.subr.bf16.mxu0 %v3785_v39  ;;  %1892 = vmatprep.subr.bf16.mxu1 %v3786_v0 }
 0x76a   :  { %1852 = vmatpush1.bf16.msra.mxu0 %v3787_v40  ;;  %1893 = vmatpush1.bf16.msra.mxu1 %v3788_v59 }
 0x76b   :  { %1853 = vmatprep.subr.bf16.mxu0 %v3789_v53  ;;  %1894 = vmatprep.subr.bf16.mxu1 %v3790_v50 }
 0x76e   :  { %1854 = vmatpush1.bf16.msra.mxu0 %v3791_v10  ;;  %1895 = vmatpush1.bf16.msra.mxu1 %v3792_v46 }
 0x76f   :  { %1855 = vmatprep.subr.bf16.mxu0 %v3793_v49  ;;  %1896 = vmatprep.subr.bf16.mxu1 %v3794_v44 }
 0x772   :  { %1856 = vmatpush1.bf16.msra.mxu0 %v3795_v42  ;;  %1897 = vmatpush1.bf16.msra.mxu1 %v3796_v43 }
 0x773   :  { %1857 = vmatprep.subr.bf16.mxu0 %v3797_v45  ;;  %1898 = vmatprep.subr.bf16.mxu1 %v3798_v47 }
 0x776   :  { %1858 = vmatpush1.bf16.msra.mxu0 %v3799_v41  ;;  %1899 = vmatpush1.bf16.msra.mxu1 %v3800_v54 }
 0x777   :  { %1859 = vmatprep.subr.bf16.mxu0 %v3801_v61  ;;  %1900 = vmatprep.subr.bf16.mxu1 %v3802_v52 }
 0x77a   :  { %1860 = vmatpush1.bf16.msra.mxu0 %v3803_v21  ;;  %1901 = vmatpush1.bf16.msra.mxu1 %v3804_v8 }
 0x77b   :  { %1927 = vmatprep.subr.bf16.mxu0 %v3805_v32  ;;  %1968 = vmatprep.subr.bf16.mxu1 %v3806_v25 }
 0x810   :  { %v1682_v28 = vpop.f32.mrb[48].mxu0  ;;  %v1723_v51 = vpop.f32.mrb[48].mxu1 }
 0x811   :  { %v1684_v36 = vpop.f32.mrb[49].mxu0  ;;  %v1725_v37 = vpop.f32.mrb[49].mxu1 }
 0x812   :  { %v1686_v26 = vpop.f32.mrb[50].mxu0  ;;  %v1727_v38 = vpop.f32.mrb[50].mxu1 }
 0x813   :  { %v1687_v39 = vpop.f32.mrb[51].mxu0  ;;  %v1728_v0 = vpop.f32.mrb[51].mxu1 }
 0x830   :  { %v1764_v40 = vpop.f32.mrb[52].mxu0  ;;  %v1805_v59 = vpop.f32.mrb[52].mxu1 }
 0x831   :  { %v1765_v53 = vadd.f32 %v1764_v40, %v1682_v28  ;;  %v1806_v50 = vadd.f32 %v1805_v59, %v1723_v51  ;;  %v1766_v10 = vpop.f32.mrb[53].mxu0  ;;  %v1807_v46 = vpop.f32.mrb[53].mxu1 }
 0x832   :  { %v1767_v49 = vadd.f32 %v1766_v10, %v1684_v36  ;;  %v1808_v44 = vadd.f32 %v1807_v46, %v1725_v37  ;;  %v1768_v42 = vpop.f32.mrb[54].mxu0  ;;  %v1809_v43 = vpop.f32.mrb[54].mxu1 }
 0x833   :  { %v1812_v45 = vadd.f32 %v1765_v53, %v2853_v30  ;;  %v1769_v47 = vpop.f32.mrb[55].mxu0  ;;  %v1810_v41 = vpop.f32.mrb[55].mxu1  ;;  %v1814_v32 = vadd.f32 %v1806_v50, %v2862_v24 }
 0x834   :  { %v1813_v54 = vadd.f32 %v1767_v49, %v2855_v19  ;;  %v1815_v21 = vadd.f32 %v1808_v44, %v2859_v9 }
 0x835   :  { %v2139_v61 = vmul.f32 -1.442695, %v1812_v45 }
 0x836   :  { %v2140_v52 = vmul.f32 -1.442695, %v1813_v54  ;;  %v2141_v8 = vmul.f32 -1.442695, %v1815_v21 }
 0x837   :  { %2348 = vpow2.f32 %v2139_v61 }
 0x838   :  { %2350 = vpow2.f32 %v2140_v52 }
 0x839   :  { %2352 = vpow2.f32 %v2141_v8 }
 0x83a   :  { %2354 = vtanh.f32 %v1814_v32 }
 0x841   :  { %v2349_v25 = vpop.eup %2348 }
 0x842   :  { %v2351_v28 = vpop.eup %2350  ;;  %v1819_v51 = vadd.f32 1.0, %v2349_v25 }
 0x843   :  { %v1825_v36 = vadd.f32 1.0, %v2351_v28  ;;  %v2353_v37 = vpop.eup %2352 }
 0x844   :  { %2356 = vrcp.f32 %v1819_v51  ;;  %v2355_v26 = vpop.eup %2354  ;;  %v1832_v40 = vadd.f32 1.0, %v2353_v37 }
 0x845   :  { %2358 = vrcp.f32 %v1825_v36 }
 0x846   :  { %2360 = vrcp.f32 %v1832_v40 }
 0x84e   :  { %v2357_v38 = vpop.eup %2356 }
 0x84f   :  { %v2359_v39 = vpop.eup %2358  ;;  %v1836_v0 = vmul.f32 %v2357_v38, %v2355_v26 }
 0x850   :  { %v1835_v59 = vmul.f32 %v2359_v39, %v3373_v48  ;;  %v2361_v50 = vpop.eup %2360 }
 0x852   :  { %v3449_v53 = vadd.f32 %v1836_v0, %v1835_v59 }
 0x854   :  { %2362 = vtanh.f32 %v3449_v53 }
 0x85e   :  { %v2363_v10 = vpop.eup %2362 }
 0x85f   :  { %v1839_v46 = vmul.f32 %v2363_v10, %v2361_v50 }
 0x861   :  { %1841 = vst [vmem:[#allocation8 + $0x30] sm:$0xff] %v1839_v46  ;;  %v1844_v49 = vpack.c.bf16 %v1839_v46, %v1839_v46 }
 0x863   :  { %1878 = vmatmul.mubr.bf16.vlgmr.msra.gmra.mrb[56].mxu0 %v1844_v49  ;;  %1919 = vmatmul.mubr.bf16.vlgmr.msra.gmra.mrb[56].mxu1 %v1844_v49 }
 0x864   :  { %1928 = vmatpush1.bf16.msra.mxu0 %v3164_v34  ;;  %1969 = vmatpush1.bf16.msra.mxu1 %v3167_v17 }
 0x865   :  { %1929 = vmatprep.subr.bf16.mxu0 %v3170_v18  ;;  %1970 = vmatprep.subr.bf16.mxu1 %v3173_v15 }
 0x866   :  { %1959 = vmatprep.mubr.bf16.mxu0 %v3659_v62  ;;  %2000 = vmatprep.mubr.bf16.mxu1 %v3659_v62  ;;  %v1843_v62 = vld [vmem:[#allocation2 + $0x1c] sm:$0xf] }
 0x868   :  { %1930 = vmatpush1.bf16.msra.mxu0 %v3178_v14  ;;  %1971 = vmatpush1.bf16.msra.mxu1 %v3181_v35 }
 0x869   :  { %1931 = vmatprep.subr.bf16.mxu0 %v3184_v11  ;;  %1972 = vmatprep.subr.bf16.mxu1 %v3187_v33 }
 0x86c   :  { %1932 = vmatpush1.bf16.msra.mxu0 %v3190_v7  ;;  %1973 = vmatpush1.bf16.msra.mxu1 %v3193_v16 }
 0x86d   :  { %1933 = vmatprep.subr.bf16.mxu0 %v3196_v29  ;;  %1974 = vmatprep.subr.bf16.mxu1 %v3199_v58 }
 0x870   :  { %1934 = vmatpush1.bf16.msra.mxu0 %v3202_v23  ;;  %1975 = vmatpush1.bf16.msra.mxu1 %v3205_v27 }
 0x871   :  { %1935 = vmatprep.subr.bf16.mxu0 %v3208_v31  ;;  %1976 = vmatprep.subr.bf16.mxu1 %v3211_v20 }
 0x874   :  { %1936 = vmatpush1.bf16.msra.mxu0 %v3214_v12  ;;  %1977 = vmatpush1.bf16.msra.mxu1 %v3217_v2 }
 0x875   :  { %1937 = vmatprep.subr.bf16.mxu0 %v3751_v4  ;;  %1978 = vmatprep.subr.bf16.mxu1 %v3752_v22 }
 0x878   :  { %1938 = vmatpush1.bf16.msra.mxu0 %v3753_v57  ;;  %1979 = vmatpush1.bf16.msra.mxu1 %v3754_v63 }
 0x879   :  { %1939 = vmatprep.subr.bf16.mxu0 %v3755_v56  ;;  %1980 = vmatprep.subr.bf16.mxu1 %v3756_v55 }
 0x87c   :  { %1940 = vmatpush1.bf16.msra.mxu0 %v3757_v60  ;;  %1981 = vmatpush1.bf16.msra.mxu1 %v3241_v3 }
 0x87d   :  { %1941 = vmatprep.subr.bf16.mxu0 %v3244_v1  ;;  %1982 = vmatprep.subr.bf16.mxu1 %v3247_v5 }
 0x880   :  { %1942 = vmatpush1.bf16.msra.mxu0 %v3250_v6  ;;  %1983 = vmatpush1.bf16.msra.mxu1 %v3253_v13 }
 0x883   :  { %1960 = vmatmul.mubr.bf16.vlgmr.msra.gmra.mrb[60].mxu0 %v1843_v62  ;;  %2001 = vmatmul.mubr.bf16.vlgmr.msra.gmra.mrb[60].mxu1 %v1843_v62 }
 0x936   :  { %v1879_v34 = vpop.f32.mrb[56].mxu0  ;;  %v1920_v17 = vpop.f32.mrb[56].mxu1 }
 0x937   :  { %v1881_v18 = vpop.f32.mrb[57].mxu0  ;;  %v1922_v15 = vpop.f32.mrb[57].mxu1 }
 0x938   :  { %v1883_v14 = vpop.f32.mrb[58].mxu0  ;;  %v1924_v35 = vpop.f32.mrb[58].mxu1 }
 0x939   :  { %v1884_v11 = vpop.f32.mrb[59].mxu0  ;;  %v1925_v33 = vpop.f32.mrb[59].mxu1 }
 0x956   :  { %v1961_v7 = vpop.f32.mrb[60].mxu0  ;;  %v2002_v16 = vpop.f32.mrb[60].mxu1 }
 0x957   :  { %v1962_v29 = vadd.f32 %v1961_v7, %v1879_v34  ;;  %v2003_v58 = vadd.f32 %v2002_v16, %v1920_v17  ;;  %v1963_v23 = vpop.f32.mrb[61].mxu0  ;;  %v2004_v27 = vpop.f32.mrb[61].mxu1 }
 0x958   :  { %v1964_v31 = vadd.f32 %v1963_v23, %v1881_v18  ;;  %v2005_v20 = vadd.f32 %v2004_v27, %v1922_v15  ;;  %v1965_v12 = vpop.f32.mrb[62].mxu0  ;;  %v2006_v2 = vpop.f32.mrb[62].mxu1 }
 0x959   :  { %v2009_v3 = vadd.f32 %v1962_v29, %v2853_v30  ;;  %v1966_v1 = vpop.f32.mrb[63].mxu0  ;;  %v2007_v5 = vpop.f32.mrb[63].mxu1  ;;  %v2011_v63 = vadd.f32 %v2003_v58, %v2862_v24 }
 0x95a   :  { %v2010_v6 = vadd.f32 %v1964_v31, %v2855_v19  ;;  %v2012_v22 = vadd.f32 %v2005_v20, %v2859_v9 }
 0x95b   :  { %v2142_v13 = vmul.f32 -1.442695, %v2009_v3 }
 0x95c   :  { %v2143_v4 = vmul.f32 -1.442695, %v2010_v6  ;;  %v2144_v57 = vmul.f32 -1.442695, %v2012_v22 }
 0x95d   :  { %2364 = vpow2.f32 %v2142_v13 }
 0x95e   :  { %2366 = vpow2.f32 %v2143_v4 }
 0x95f   :  { %2368 = vpow2.f32 %v2144_v57 }
 0x960   :  { %2370 = vtanh.f32 %v2011_v63 }
 0x967   :  { %v2365_v56 = vpop.eup %2364 }
 0x968   :  { %v2367_v55 = vpop.eup %2366  ;;  %v2016_v60 = vadd.f32 1.0, %v2365_v56 }
 0x969   :  { %v2022_v48 = vadd.f32 1.0, %v2367_v55  ;;  %v2369_v30 = vpop.eup %2368 }
 0x96a   :  { %2372 = vrcp.f32 %v2016_v60  ;;  %v2371_v44 = vpop.eup %2370  ;;  %v2029_v45 = vadd.f32 1.0, %v2369_v30 }
 0x96b   :  { %2374 = vrcp.f32 %v2022_v48 }
 0x96c   :  { %2376 = vrcp.f32 %v2029_v45 }
 0x974   :  { %v2373_v19 = vpop.eup %2372 }
 0x975   :  { %v2375_v42 = vpop.eup %2374  ;;  %v2033_v43 = vmul.f32 %v2373_v19, %v2371_v44 }
 0x976   :  { %v2032_v47 = vmul.f32 %v2375_v42, %v3449_v53  ;;  %v2377_v24 = vpop.eup %2376 }
 0x978   :  { %v2034_v9 = vadd.f32 %v2033_v43, %v2032_v47 }
 0x97a   :  { %2378 = vtanh.f32 %v2034_v9 }
 0x984   :  { %v2379_v41 = vpop.eup %2378 }
 0x985   :  { %v2036_v54 = vmul.f32 %v2379_v41, %v2377_v24 }
 0x987   :  { %2038 = vst [vmem:[#allocation8 + $0x38] sm:$0xff] %v2036_v54 }
 0x988   :  { %2521 = shalt.err (!%p2518_p0)
}
 0x989   :  { %s2522_s6 = scalar_lea.hbm %s3505_s4, 1024 }
 0x98a   :  { %p2523_p1 = scmp.ne.s32.totalorder %s3505_s4, %s2522_s6  ;;  %p2526_p2 = scmp.lt.u32.totalorder %s2522_s6, %s3505_s4 }
 0x98c   :  { %p2528_p3 = pnand %p2526_p2, %p2523_p1 }
 0x98e   :  { %2531 = shalt.err (!%p2528_p3)
}
 0x98f   :  { %s2547_s11 = smov 128   ;;  %s2548_s12 = smov 8  }
 0x990   :  { %2050 = dma.vmem_to_hbm [thread:$0]  %s2045_s26, 1024, %s3505_s4, [#allocation4], %s2547_s11, %s2547_s11, %s2548_s12  }
 0x991   :  { %2536 = dma.done.wait [#allocation4], 1024  }
 0x992   :  { %2537 = vsyncadd [#allocation4], 4294966272 }
 0x993   :  { %2054 = vsyncpa [#allocation3], 1 }
 0x994   :  { %2055 = vsyncpa [#allocation6], 1 }
 0x995   :  { %2056 = vsyncpa [#allocation4], 1 }

</bundles_post_ra>
